<compile_context>
chip_gen: v7x
topology: tpu7x:2x2x1
jax: 0.10.0
libtpu: 0.0.40
codegen_flags: <defaults>
</compile_context>

<pallas_src>
import functools
import math

import jax
import jax.numpy as jnp
from jax.experimental import pallas as pl
from jax.experimental.pallas import tpu as pltpu

ALPHA = 0.5          # module default alpha
EPS = 1e-6           # nn.CosineSimilarity eps
OUT_LANES = 128      # lane-dense packed output width (>= 2 * num_groups)


def _round_up(x, m):
    return ((x + m - 1) // m) * m


def _score_kernel(xu_ref, xv_ref, agg_ref, roots_ref, bptr_ref,
                  w_root_ref, bias_ref, w_ego_u_ref, w_layer_v_ref,
                  out_ref, acc_ref):
    j = pl.program_id(1)

    # ---- V reduction: group-independent edge aggregation  acc += agg @ x[v] ----
    @pl.when(j == 0)
    def _():
        acc_ref[...] = jnp.zeros_like(acc_ref)

    acc_ref[...] += jnp.dot(agg_ref[...], xv_ref[...],          # bf16 x bf16 -> f32 (MXU)
                            preferred_element_type=jnp.float32)

    # ---- epilogue on the last V tile: per-group scoring ----
    @pl.when(j == pl.num_programs(1) - 1)
    def _():
        tile_u, _ = acc_ref.shape
        num_roots = roots_ref.shape[0]
        num_groups = w_root_ref.shape[0]
        out_lanes = out_ref.shape[1]

        xu = xu_ref[...]                                        # [TILE_U, Fp] f32
        agg_x = acc_ref[...]                                    # [TILE_U, Fp] f32
        roots = roots_ref[...]                                  # [Bp, Fp]     f32
        w_root = w_root_ref[...]
        w_bias = bias_ref[...]
        w_ego_u = w_ego_u_ref[...]
        w_layer_v = w_layer_v_ref[...]

        # one-hot candidate -> root selection (gather expressed as a tiny matmul)
        bptr = bptr_ref[...]                                    # [TILE_U, 1] int32
        root_iota = jax.lax.broadcasted_iota(jnp.int32, (tile_u, num_roots), 1)
        sel = jnp.where(root_iota == bptr, 1.0, 0.0).astype(jnp.bfloat16)

        lane = jax.lax.broadcasted_iota(jnp.int32, (tile_u, out_lanes), 1)
        out = jnp.zeros((tile_u, out_lanes), jnp.float32)

        for g in range(num_groups):                             # static unroll, G small
            wr = w_root[g:g + 1, :]
            wb = w_bias[g:g + 1, :]
            wu = w_ego_u[g:g + 1, :]
            wv = w_layer_v[g:g + 1, :]

            # h_roots and its (eps-clamped) norm computed ONCE per root
            h_r = roots * wr + wb                               # [Bp, Fp]
            nr = jnp.sqrt(jnp.sum(h_r * h_r, axis=-1, keepdims=True))
            r_hat = (h_r / jnp.maximum(nr, EPS)).astype(jnp.bfloat16)

            # h_u = x[u]*w_ego_u + (agg @ x[v]) * w_layer_v  (w_layer_v factored out
            # of the scatter-sum; /num_batch_nodes dropped: cosine is scale invariant)
            h_u = xu * wu + agg_x * wv                          # [TILE_U, Fp] f32
            nu = jnp.sqrt(jnp.sum(h_u * h_u, axis=-1, keepdims=True))

            # gather normalized root row per candidate, then cosine similarity
            r_sel = jnp.dot(sel, r_hat, preferred_element_type=jnp.float32)
            dot = jnp.sum(h_u * r_sel, axis=-1, keepdims=True)  # [TILE_U, 1]
            cos = dot / jnp.maximum(nu, EPS)

            p_u = ALPHA * cos
            p_clip = jnp.abs(p_u - ALPHA + 1.0)

            out = out + jnp.where(lane == g, p_u, 0.0)
            out = out + jnp.where(lane == num_groups + g, p_clip, 0.0)

        out_ref[...] = out


@functools.partial(jax.jit, static_argnames=("tile_u", "tile_v"))
def adaptive_sampler_scores(xu, xv, agg, roots, batch_ptr,
                            w_root, bias, w_ego_u, w_layer_v,
                            *, tile_u=128, tile_v=128):
    """One hop of AdaptiveSampler.batch_wise_sampling scoring, all groups.

    xu        [U, F] f32   candidate (unique neighbour) features  x[u_idx]
    xv        [V, F] f32   frontier features                      x[v]
    agg       [U, V] f32   dense edge scatter matrix (edge counts v -> u)
    roots     [B, F] f32   root features                          x[batch_nodes]
    batch_ptr [U]    int   candidate -> batch member index
    w_*       [G, F] f32   per-group parameters (w_layer_v flattened)
    returns (p_u, p_clip), each [U, G] float32.
    """
    U, F = xu.shape
    V = xv.shape[0]
    B = roots.shape[0]
    G = w_root.shape[0]
    assert 2 * G <= OUT_LANES

    fp = _round_up(F, 128)          # lane-pad features (zero pad is exact)
    up = _round_up(U, tile_u)
    vp = _round_up(V, tile_v)
    bp = _round_up(B, 8)

    pad_f = fp - F
    xu_p = jnp.pad(xu, ((0, up - U), (0, pad_f)))
    xv_p = jnp.pad(xv, ((0, vp - V), (0, pad_f))).astype(jnp.bfloat16)
    agg_p = jnp.pad(agg, ((0, up - U), (0, vp - V))).astype(jnp.bfloat16)
    roots_p = jnp.pad(roots, ((0, bp - B), (0, pad_f)))
    bptr_p = jnp.pad(batch_ptr.astype(jnp.int32), (0, up - U)).reshape(up, 1)
    w_root_p = jnp.pad(w_root, ((0, 0), (0, pad_f)))
    bias_p = jnp.pad(bias, ((0, 0), (0, pad_f)))
    w_ego_u_p = jnp.pad(w_ego_u, ((0, 0), (0, pad_f)))
    w_layer_v_p = jnp.pad(w_layer_v, ((0, 0), (0, pad_f)))

    grid = (up // tile_u, vp // tile_v)

    def rep(shape):  # loop-invariant (replicated) operand
        return pl.BlockSpec(shape, lambda i, j: (0, 0))

    in_specs = [
        pl.BlockSpec((tile_u, fp), lambda i, j: (i, 0)),       # xu
        pl.BlockSpec((tile_v, fp), lambda i, j: (j, 0)),       # xv (bf16)
        pl.BlockSpec((tile_u, tile_v), lambda i, j: (i, j)),   # agg (bf16)
        rep((bp, fp)),                                         # roots
        pl.BlockSpec((tile_u, 1), lambda i, j: (i, 0)),        # batch_ptr
        rep((G, fp)), rep((G, fp)), rep((G, fp)), rep((G, fp)),  # weights
    ]
    out_specs = pl.BlockSpec((tile_u, OUT_LANES), lambda i, j: (i, 0))

    flops = 2 * up * vp * fp + G * (2 * up * bp * fp + 8 * up * fp)
    bytes_accessed = (4 * up * fp + 2 * vp * fp + 2 * up * vp + 4 * bp * fp
                      + 4 * up + 16 * G * fp + 4 * up * OUT_LANES)

    scores = pl.pallas_call(
        _score_kernel,
        out_shape=jax.ShapeDtypeStruct((up, OUT_LANES), jnp.float32),
        grid_spec=pltpu.PrefetchScalarGridSpec(
            num_scalar_prefetch=0,
            grid=grid,
            in_specs=in_specs,
            out_specs=out_specs,
            scratch_shapes=[pltpu.VMEM((tile_u, fp), jnp.float32)],
        ),
        compiler_params=pltpu.CompilerParams(
            dimension_semantics=("parallel", "arbitrary"),
            vmem_limit_bytes=32 * 1024 * 1024,
        ),
        cost_estimate=pl.CostEstimate(
            flops=flops,
            transcendentals=G * (up + bp),
            bytes_accessed=bytes_accessed),
    )(xu_p, xv_p, agg_p, roots_p, bptr_p,
      w_root_p, bias_p, w_ego_u_p, w_layer_v_p)

    p_u = scores[:U, :G]
    p_clip = scores[:U, G:2 * G]
    return p_u, p_clip


def _ref_scores(xu, xv, agg, roots, batch_ptr, w_root, bias, w_ego_u, w_layer_v,
                num_batch_nodes):
    """Plain-JAX mirror of the PyTorch scoring.

    The kernel's MXU operands are bf16 (agg, x[v], and the eps-clamped
    normalized root rows); the same quantization is applied here so the
    comparison isolates kernel bugs rather than MXU input rounding.  The
    h_u / num_batch_nodes scaling of the original is kept here (the kernel
    drops it: cosine similarity is invariant to positive row scales).
    """
    f32 = jnp.float32
    xv_q = xv.astype(jnp.bfloat16).astype(f32)
    agg_q = agg.astype(jnp.bfloat16).astype(f32)
    n_u = num_batch_nodes[batch_ptr][:, None]
    p_us, p_clips = [], []
    for g in range(w_root.shape[0]):
        h_roots = roots * w_root[g] + bias[g]                         # [B, F]
        nr = jnp.sqrt(jnp.sum(h_roots * h_roots, -1, keepdims=True))
        r_hat = (h_roots / jnp.maximum(nr, EPS)
                 ).astype(jnp.bfloat16).astype(f32)
        h_v = xv_q * w_layer_v[g]                                     # [V, F]
        scat = jnp.dot(agg_q, h_v, precision=jax.lax.Precision.HIGHEST)
        h_u = xu * w_ego_u[g] + scat                                  # [U, F]
        h_u = h_u / n_u
        nu = jnp.sqrt(jnp.sum(h_u * h_u, -1))
        dot = jnp.sum(r_hat[batch_ptr] * h_u, -1)
        cos = dot / jnp.maximum(nu, EPS)
        p_u = ALPHA * cos
        p_us.append(p_u)
        p_clips.append(jnp.abs(p_u - ALPHA + 1.0))
    return jnp.stack(p_us, -1), jnp.stack(p_clips, -1)


if __name__ == "__main__":
    master = jax.random.PRNGKey(0)
    NUM_GROUPS = 2

    def make_problem(key, n_nodes, n_feat, n_roots, n_front, n_cand):
        ks = jax.random.split(key, 9)
        x = jax.random.normal(ks[0], (n_nodes, n_feat), jnp.float32)
        batch_nodes = jnp.arange(n_roots)                            # root node ids
        v = jax.random.randint(ks[1], (n_front,), 0, n_nodes)        # frontier ids
        u_idx = jax.random.randint(ks[2], (n_cand,), 0, n_nodes)     # candidate ids
        batch_ptr = jnp.sort(jax.random.randint(ks[3], (n_cand,), 0, n_roots))
        # dense edge scatter matrix (stand-in for sample_adj + scatter over edge_inv)
        agg = (jax.random.uniform(ks[4], (n_cand, n_front)) < 0.4).astype(jnp.float32)
        # per-batch-member candidate counts (module's num_batch_nodes)
        num_batch_nodes = jnp.maximum(
            jnp.bincount(batch_ptr, length=n_roots), 1).astype(jnp.float32)
        # reset_parameters: uniform(-1/sqrt(F), 1/sqrt(F)) for the used weights
        bound = 1.0 / math.sqrt(n_feat)

        def unif(k):
            return jax.random.uniform(k, (NUM_GROUPS, n_feat), jnp.float32,
                                      -bound, bound)

        w_root, w_ego_u, w_layer_v, bias = (unif(ks[5]), unif(ks[6]),
                                            unif(ks[7]), unif(ks[8]))
        return (x[u_idx], x[v], agg, x[batch_nodes], batch_ptr.astype(jnp.int32),
                w_root, bias, w_ego_u, w_layer_v, num_batch_nodes)

    configs = [  # (nodes, features, roots B, frontier V, candidates U)
        (64, 32, 8, 8, 32),       # hop-1-like toy case, single tile
        (512, 32, 8, 200, 300),   # multi-tile: exercises V reduction + U grid
    ]

    ok = True
    for cfg_key, cfg in zip(jax.random.split(master, len(configs)), configs):
        (xu, xv, agg, roots, bptr, w_root, bias, w_ego_u, w_layer_v,
         num_batch_nodes) = make_problem(cfg_key, *cfg)

        p_u, p_clip = adaptive_sampler_scores(
            xu, xv, agg, roots, bptr, w_root, bias, w_ego_u, w_layer_v)
        jax.block_until_ready((p_u, p_clip))

        p_u_ref, p_clip_ref = _ref_scores(
            xu, xv, agg, roots, bptr, w_root, bias, w_ego_u, w_layer_v,
            num_batch_nodes)

        # tolerance covers f32 accumulation-order differences and rare single-ulp
        # bf16 rounding flips of the normalized root rows; structural bugs are O(0.1+)
        ok &= bool(jnp.allclose(p_u, p_u_ref, atol=1e-3, rtol=1e-3))
        ok &= bool(jnp.allclose(p_clip, p_clip_ref, atol=1e-3, rtol=1e-3))

    # TODO(synk): torch.multinomial sampling, torch.unique/inverse bookkeeping,
    # adj_t.sample_adj neighbor expansion and the budget/max_hop while-loop of
    # batch_wise_sampling are data-dependent host-side control flow with no
    # clean Pallas equivalent; they remain outside the kernel.

    print("KERNEL_OK" if ok else "KERNEL_MISMATCH")
</pallas_src>

<mosaic_0001>
module attributes {stable_mosaic.version = 11 : i64} {
  func.func @_score_kernel(%arg0: i32, %arg1: i32, %arg2: memref<128x128xf32, #tpu.memory_space<vmem>>, %arg3: memref<128x128xbf16, #tpu.memory_space<vmem>>, %arg4: memref<128x128xbf16, #tpu.memory_space<vmem>>, %arg5: memref<8x128xf32, #tpu.memory_space<vmem>>, %arg6: memref<128x1xi32, #tpu.memory_space<vmem>>, %arg7: memref<2x128xf32, #tpu.memory_space<vmem>>, %arg8: memref<2x128xf32, #tpu.memory_space<vmem>>, %arg9: memref<2x128xf32, #tpu.memory_space<vmem>>, %arg10: memref<2x128xf32, #tpu.memory_space<vmem>>, %arg11: memref<128x128xf32, #tpu.memory_space<vmem>>, %arg12: memref<128x128xf32, #tpu.memory_space<vmem>>) attributes {dimension_semantics = [#tpu.dimension_semantics<parallel>, #tpu.dimension_semantics<arbitrary>], iteration_bounds = array<i64: 1, 1>, scalar_prefetch = 0 : i64, scratch_operands = 1 : i64, tpu.core_type = #tpu.core_type<tc>, window_params = [{transform_indices = @transform_0, window_bounds = array<i64: 128, 128>}, {transform_indices = @transform_1, window_bounds = array<i64: 128, 128>}, {transform_indices = @transform_2, window_bounds = array<i64: 128, 128>}, {pipeline_mode = #tpu.pipeline_mode<synchronous>, transform_indices = @transform_3, window_bounds = array<i64: 8, 128>}, {transform_indices = @transform_4, window_bounds = array<i64: 128, 1>}, {pipeline_mode = #tpu.pipeline_mode<synchronous>, transform_indices = @transform_5, window_bounds = array<i64: 2, 128>}, {pipeline_mode = #tpu.pipeline_mode<synchronous>, transform_indices = @transform_6, window_bounds = array<i64: 2, 128>}, {pipeline_mode = #tpu.pipeline_mode<synchronous>, transform_indices = @transform_7, window_bounds = array<i64: 2, 128>}, {pipeline_mode = #tpu.pipeline_mode<synchronous>, transform_indices = @transform_8, window_bounds = array<i64: 2, 128>}, {transform_indices = @transform_9, window_bounds = array<i64: 128, 128>}]} {
    %c0_i32 = arith.constant 0 : i32
    %0 = arith.cmpi eq, %arg1, %c0_i32 : i32
    %1 = arith.extui %0 : i1 to i32
    %c0_i32_0 = arith.constant 0 : i32
    %2 = arith.cmpi ne, %1, %c0_i32_0 : i32
    scf.if %2 {
      %cst_10 = arith.constant 0.000000e+00 : f32
      %12 = vector.broadcast %cst_10 : f32 to vector<128x128xf32>
      %c0_11 = arith.constant 0 : index
      %c0_12 = arith.constant 0 : index
      %13 = vector.load %arg12[%c0_11, %c0_12] : memref<128x128xf32, #tpu.memory_space<vmem>>, vector<128x128xf32>
      tpu.vector_store %arg12[%c0_11, %c0_12], %12 {strides = array<i32>} : memref<128x128xf32, #tpu.memory_space<vmem>>, vector<128x128xf32>,
    } else {
    }
    %c0 = arith.constant 0 : index
    %c0_1 = arith.constant 0 : index
    %3 = vector.load %arg12[%c0, %c0_1] : memref<128x128xf32, #tpu.memory_space<vmem>>, vector<128x128xf32>
    %c0_2 = arith.constant 0 : index
    %c0_3 = arith.constant 0 : index
    %4 = vector.load %arg4[%c0_2, %c0_3] : memref<128x128xbf16, #tpu.memory_space<vmem>>, vector<128x128xbf16>
    %c0_4 = arith.constant 0 : index
    %c0_5 = arith.constant 0 : index
    %5 = vector.load %arg3[%c0_4, %c0_5] : memref<128x128xbf16, #tpu.memory_space<vmem>>, vector<128x128xbf16>
    %cst = arith.constant dense<0.000000e+00> : vector<128x128xf32>
    %6 = tpu.matmul %4, %5, %cst {dimension_numbers = #tpu.dot_dimension_numbers<[1], [0], [0], [1], [0, 0, 1, 1], [], []>} : vector<128x128xbf16>, vector<128x128xbf16>, vector<128x128xf32> -> vector<128x128xf32>
    %7 = arith.addf %3, %6 : vector<128x128xf32>
    %c0_6 = arith.constant 0 : index
    %c0_7 = arith.constant 0 : index
    %8 = vector.load %arg12[%c0_6, %c0_7] : memref<128x128xf32, #tpu.memory_space<vmem>>, vector<128x128xf32>
    tpu.vector_store %arg12[%c0_6, %c0_7], %7 {strides = array<i32>} : memref<128x128xf32, #tpu.memory_space<vmem>>, vector<128x128xf32>,
    %c0_i32_8 = arith.constant 0 : i32
    %9 = arith.cmpi eq, %arg1, %c0_i32_8 : i32
    %10 = arith.extui %9 : i1 to i32
    %c0_i32_9 = arith.constant 0 : i32
    %11 = arith.cmpi ne, %10, %c0_i32_9 : i32
    scf.if %11 {
      %c0_10 = arith.constant 0 : index
      %c0_11 = arith.constant 0 : index
      %12 = vector.load %arg2[%c0_10, %c0_11] : memref<128x128xf32, #tpu.memory_space<vmem>>, vector<128x128xf32>
      %c0_12 = arith.constant 0 : index
      %c0_13 = arith.constant 0 : index
      %13 = vector.load %arg12[%c0_12, %c0_13] : memref<128x128xf32, #tpu.memory_space<vmem>>, vector<128x128xf32>
      %c0_14 = arith.constant 0 : index
      %c0_15 = arith.constant 0 : index
      %14 = vector.load %arg5[%c0_14, %c0_15] : memref<8x128xf32, #tpu.memory_space<vmem>>, vector<8x128xf32>
      %c0_16 = arith.constant 0 : index
      %c0_17 = arith.constant 0 : index
      %15 = vector.load %arg7[%c0_16, %c0_17] : memref<2x128xf32, #tpu.memory_space<vmem>>, vector<2x128xf32>
      %c0_18 = arith.constant 0 : index
      %c0_19 = arith.constant 0 : index
      %16 = vector.load %arg8[%c0_18, %c0_19] : memref<2x128xf32, #tpu.memory_space<vmem>>, vector<2x128xf32>
      %c0_20 = arith.constant 0 : index
      %c0_21 = arith.constant 0 : index
      %17 = vector.load %arg9[%c0_20, %c0_21] : memref<2x128xf32, #tpu.memory_space<vmem>>, vector<2x128xf32>
      %c0_22 = arith.constant 0 : index
      %c0_23 = arith.constant 0 : index
      %18 = vector.load %arg10[%c0_22, %c0_23] : memref<2x128xf32, #tpu.memory_space<vmem>>, vector<2x128xf32>
      %c0_24 = arith.constant 0 : index
      %c0_25 = arith.constant 0 : index
      %19 = vector.load %arg6[%c0_24, %c0_25] : memref<128x1xi32, #tpu.memory_space<vmem>>, vector<128x1xi32>
      %20 = tpu.iota {dimensions = array<i32: 1>} : vector<128x8xi32>
      %21 = vector.broadcast %19 : vector<128x1xi32> to vector<128x8xi32>
      %22 = arith.cmpi eq, %20, %21 : vector<128x8xi32>
      %cst_26 = arith.constant 1.000000e+00 : f32
      %cst_27 = arith.constant 0.000000e+00 : f32
      %23 = vector.broadcast %cst_26 : f32 to vector<128x8xf32>
      %24 = vector.broadcast %cst_27 : f32 to vector<128x8xf32>
      %25 = arith.select %22, %23, %24 : vector<128x8xi1>, vector<128x8xf32>
      %26 = arith.truncf %25 : vector<128x8xf32> to vector<128x8xbf16>
      %27 = tpu.iota {dimensions = array<i32: 1>} : vector<128x128xi32>
      %cst_28 = arith.constant 0.000000e+00 : f32
      %28 = vector.broadcast %cst_28 : f32 to vector<128x128xf32>
      %29 = vector.extract_strided_slice %15 {offsets = [0, 0], sizes = [1, 128], strides = [1, 1]} : vector<2x128xf32> to vector<1x128xf32>
      %30 = vector.extract_strided_slice %16 {offsets = [0, 0], sizes = [1, 128], strides = [1, 1]} : vector<2x128xf32> to vector<1x128xf32>
      %31 = vector.extract_strided_slice %17 {offsets = [0, 0], sizes = [1, 128], strides = [1, 1]} : vector<2x128xf32> to vector<1x128xf32>
      %32 = vector.extract_strided_slice %18 {offsets = [0, 0], sizes = [1, 128], strides = [1, 1]} : vector<2x128xf32> to vector<1x128xf32>
      %33 = vector.broadcast %29 : vector<1x128xf32> to vector<8x128xf32>
      %34 = arith.mulf %14, %33 : vector<8x128xf32>
      %35 = vector.broadcast %30 : vector<1x128xf32> to vector<8x128xf32>
      %36 = arith.addf %34, %35 : vector<8x128xf32>
      %37 = arith.mulf %36, %36 : vector<8x128xf32>
      %cst_29 = arith.constant dense<0.000000e+00> : vector<8xf32>
      %38 = vector.multi_reduction <add>, %37, %cst_29 [1] : vector<8x128xf32> to vector<8xf32>
      %39 = vector.shape_cast %38 : vector<8xf32> to vector<8x1xf32>
      %40 = math.sqrt %39 : vector<8x1xf32>
      %cst_30 = arith.constant 9.99999997E-7 : f32
      %41 = vector.broadcast %cst_30 : f32 to vector<8x1xf32>
      %42 = arith.maximumf %40, %41 : vector<8x1xf32>
      %43 = vector.broadcast %42 : vector<8x1xf32> to vector<8x128xf32>
      %44 = arith.divf %36, %43 : vector<8x128xf32>
      %45 = arith.truncf %44 : vector<8x128xf32> to vector<8x128xbf16>
      %46 = vector.broadcast %31 : vector<1x128xf32> to vector<128x128xf32>
      %47 = arith.mulf %12, %46 : vector<128x128xf32>
      %48 = vector.broadcast %32 : vector<1x128xf32> to vector<128x128xf32>
      %49 = arith.mulf %13, %48 : vector<128x128xf32>
      %50 = arith.addf %47, %49 : vector<128x128xf32>
      %51 = arith.mulf %50, %50 : vector<128x128xf32>
      %cst_31 = arith.constant dense<0.000000e+00> : vector<128xf32>
      %52 = vector.multi_reduction <add>, %51, %cst_31 [1] : vector<128x128xf32> to vector<128xf32>
      %53 = vector.shape_cast %52 : vector<128xf32> to vector<128x1xf32>
      %54 = math.sqrt %53 : vector<128x1xf32>
      %cst_32 = arith.constant dense<0.000000e+00> : vector<128x128xf32>
      %55 = tpu.matmul %26, %45, %cst_32 {dimension_numbers = #tpu.dot_dimension_numbers<[1], [0], [0], [1], [0, 0, 1, 1], [], []>} : vector<128x8xbf16>, vector<8x128xbf16>, vector<128x128xf32> -> vector<128x128xf32>
      %56 = arith.mulf %50, %55 : vector<128x128xf32>
      %cst_33 = arith.constant dense<0.000000e+00> : vector<128xf32>
      %57 = vector.multi_reduction <add>, %56, %cst_33 [1] : vector<128x128xf32> to vector<128xf32>
      %58 = vector.shape_cast %57 : vector<128xf32> to vector<128x1xf32>
      %cst_34 = arith.constant 9.99999997E-7 : f32
      %59 = vector.broadcast %cst_34 : f32 to vector<128x1xf32>
      %60 = arith.maximumf %54, %59 : vector<128x1xf32>
      %61 = arith.divf %58, %60 : vector<128x1xf32>
      %cst_35 = arith.constant 5.000000e-01 : f32
      %62 = vector.broadcast %cst_35 : f32 to vector<128x1xf32>
      %63 = arith.mulf %62, %61 : vector<128x1xf32>
      %cst_36 = arith.constant 5.000000e-01 : f32
      %64 = vector.broadcast %cst_36 : f32 to vector<128x1xf32>
      %65 = arith.subf %63, %64 : vector<128x1xf32>
      %cst_37 = arith.constant 1.000000e+00 : f32
      %66 = vector.broadcast %cst_37 : f32 to vector<128x1xf32>
      %67 = arith.addf %65, %66 : vector<128x1xf32>
      %68 = math.absf %67 : vector<128x1xf32>
      %c0_i32_38 = arith.constant 0 : i32
      %69 = vector.broadcast %c0_i32_38 : i32 to vector<128x128xi32>
      %70 = arith.cmpi eq, %27, %69 : vector<128x128xi32>
      %cst_39 = arith.constant 0.000000e+00 : f32
      %71 = vector.shape_cast %63 : vector<128x1xf32> to vector<128x1xf32>
      %72 = vector.broadcast %71 : vector<128x1xf32> to vector<128x128xf32>
      %73 = vector.broadcast %cst_39 : f32 to vector<128x128xf32>
      %74 = arith.select %70, %72, %73 : vector<128x128xi1>, vector<128x128xf32>
      %75 = arith.addf %28, %74 : vector<128x128xf32>
      %c2_i32 = arith.constant 2 : i32
      %76 = vector.broadcast %c2_i32 : i32 to vector<128x128xi32>
      %77 = arith.cmpi eq, %27, %76 : vector<128x128xi32>
      %cst_40 = arith.constant 0.000000e+00 : f32
      %78 = vector.shape_cast %68 : vector<128x1xf32> to vector<128x1xf32>
      %79 = vector.broadcast %78 : vector<128x1xf32> to vector<128x128xf32>
      %80 = vector.broadcast %cst_40 : f32 to vector<128x128xf32>
      %81 = arith.select %77, %79, %80 : vector<128x128xi1>, vector<128x128xf32>
      %82 = arith.addf %75, %81 : vector<128x128xf32>
      %83 = vector.extract_strided_slice %15 {offsets = [1, 0], sizes = [1, 128], strides = [1, 1]} : vector<2x128xf32> to vector<1x128xf32>
      %84 = vector.extract_strided_slice %16 {offsets = [1, 0], sizes = [1, 128], strides = [1, 1]} : vector<2x128xf32> to vector<1x128xf32>
      %85 = vector.extract_strided_slice %17 {offsets = [1, 0], sizes = [1, 128], strides = [1, 1]} : vector<2x128xf32> to vector<1x128xf32>
      %86 = vector.extract_strided_slice %18 {offsets = [1, 0], sizes = [1, 128], strides = [1, 1]} : vector<2x128xf32> to vector<1x128xf32>
      %87 = vector.broadcast %83 : vector<1x128xf32> to vector<8x128xf32>
      %88 = arith.mulf %14, %87 : vector<8x128xf32>
      %89 = vector.broadcast %84 : vector<1x128xf32> to vector<8x128xf32>
      %90 = arith.addf %88, %89 : vector<8x128xf32>
      %91 = arith.mulf %90, %90 : vector<8x128xf32>
      %cst_41 = arith.constant dense<0.000000e+00> : vector<8xf32>
      %92 = vector.multi_reduction <add>, %91, %cst_41 [1] : vector<8x128xf32> to vector<8xf32>
      %93 = vector.shape_cast %92 : vector<8xf32> to vector<8x1xf32>
      %94 = math.sqrt %93 : vector<8x1xf32>
      %cst_42 = arith.constant 9.99999997E-7 : f32
      %95 = vector.broadcast %cst_42 : f32 to vector<8x1xf32>
      %96 = arith.maximumf %94, %95 : vector<8x1xf32>
      %97 = vector.broadcast %96 : vector<8x1xf32> to vector<8x128xf32>
      %98 = arith.divf %90, %97 : vector<8x128xf32>
      %99 = arith.truncf %98 : vector<8x128xf32> to vector<8x128xbf16>
      %100 = vector.broadcast %85 : vector<1x128xf32> to vector<128x128xf32>
      %101 = arith.mulf %12, %100 : vector<128x128xf32>
      %102 = vector.broadcast %86 : vector<1x128xf32> to vector<128x128xf32>
      %103 = arith.mulf %13, %102 : vector<128x128xf32>
      %104 = arith.addf %101, %103 : vector<128x128xf32>
      %105 = arith.mulf %104, %104 : vector<128x128xf32>
      %cst_43 = arith.constant dense<0.000000e+00> : vector<128xf32>
      %106 = vector.multi_reduction <add>, %105, %cst_43 [1] : vector<128x128xf32> to vector<128xf32>
      %107 = vector.shape_cast %106 : vector<128xf32> to vector<128x1xf32>
      %108 = math.sqrt %107 : vector<128x1xf32>
      %cst_44 = arith.constant dense<0.000000e+00> : vector<128x128xf32>
      %109 = tpu.matmul %26, %99, %cst_44 {dimension_numbers = #tpu.dot_dimension_numbers<[1], [0], [0], [1], [0, 0, 1, 1], [], []>} : vector<128x8xbf16>, vector<8x128xbf16>, vector<128x128xf32> -> vector<128x128xf32>
      %110 = arith.mulf %104, %109 : vector<128x128xf32>
      %cst_45 = arith.constant dense<0.000000e+00> : vector<128xf32>
      %111 = vector.multi_reduction <add>, %110, %cst_45 [1] : vector<128x128xf32> to vector<128xf32>
      %112 = vector.shape_cast %111 : vector<128xf32> to vector<128x1xf32>
      %cst_46 = arith.constant 9.99999997E-7 : f32
      %113 = vector.broadcast %cst_46 : f32 to vector<128x1xf32>
      %114 = arith.maximumf %108, %113 : vector<128x1xf32>
      %115 = arith.divf %112, %114 : vector<128x1xf32>
      %cst_47 = arith.constant 5.000000e-01 : f32
      %116 = vector.broadcast %cst_47 : f32 to vector<128x1xf32>
      %117 = arith.mulf %116, %115 : vector<128x1xf32>
      %cst_48 = arith.constant 5.000000e-01 : f32
      %118 = vector.broadcast %cst_48 : f32 to vector<128x1xf32>
      %119 = arith.subf %117, %118 : vector<128x1xf32>
      %cst_49 = arith.constant 1.000000e+00 : f32
      %120 = vector.broadcast %cst_49 : f32 to vector<128x1xf32>
      %121 = arith.addf %119, %120 : vector<128x1xf32>
      %122 = math.absf %121 : vector<128x1xf32>
      %c1_i32 = arith.constant 1 : i32
      %123 = vector.broadcast %c1_i32 : i32 to vector<128x128xi32>
      %124 = arith.cmpi eq, %27, %123 : vector<128x128xi32>
      %cst_50 = arith.constant 0.000000e+00 : f32
      %125 = vector.shape_cast %117 : vector<128x1xf32> to vector<128x1xf32>
      %126 = vector.broadcast %125 : vector<128x1xf32> to vector<128x128xf32>
      %127 = vector.broadcast %cst_50 : f32 to vector<128x128xf32>
      %128 = arith.select %124, %126, %127 : vector<128x128xi1>, vector<128x128xf32>
      %129 = arith.addf %82, %128 : vector<128x128xf32>
      %c3_i32 = arith.constant 3 : i32
      %130 = vector.broadcast %c3_i32 : i32 to vector<128x128xi32>
      %131 = arith.cmpi eq, %27, %130 : vector<128x128xi32>
      %cst_51 = arith.constant 0.000000e+00 : f32
      %132 = vector.shape_cast %122 : vector<128x1xf32> to vector<128x1xf32>
      %133 = vector.broadcast %132 : vector<128x1xf32> to vector<128x128xf32>
      %134 = vector.broadcast %cst_51 : f32 to vector<128x128xf32>
      %135 = arith.select %131, %133, %134 : vector<128x128xi1>, vector<128x128xf32>
      %136 = arith.addf %129, %135 : vector<128x128xf32>
      %c0_52 = arith.constant 0 : index
      %c0_53 = arith.constant 0 : index
      %137 = vector.load %arg11[%c0_52, %c0_53] : memref<128x128xf32, #tpu.memory_space<vmem>>, vector<128x128xf32>
      tpu.vector_store %arg11[%c0_52, %c0_53], %136 {strides = array<i32>} : memref<128x128xf32, #tpu.memory_space<vmem>>, vector<128x128xf32>,
    } else {
    }
    return
  }
  func.func @transform_0(%arg0: i32, %arg1: i32) -> (i32, i32) {
    %c0_i32 = arith.constant 0 : i32
    %c0_i32_0 = arith.constant 0 : i32
    return %arg0, %c0_i32 : i32, i32
  }
  func.func @transform_1(%arg0: i32, %arg1: i32) -> (i32, i32) {
    %c0_i32 = arith.constant 0 : i32
    %c0_i32_0 = arith.constant 0 : i32
    return %arg1, %c0_i32 : i32, i32
  }
  func.func @transform_2(%arg0: i32, %arg1: i32) -> (i32, i32) {
    %c0_i32 = arith.constant 0 : i32
    return %arg0, %arg1 : i32, i32
  }
  func.func @transform_3(%arg0: i32, %arg1: i32) -> (i32, i32) {
    %c0_i32 = arith.constant 0 : i32
    %c0_i32_0 = arith.constant 0 : i32
    %c0_i32_1 = arith.constant 0 : i32
    return %c0_i32, %c0_i32_0 : i32, i32
  }
  func.func @transform_4(%arg0: i32, %arg1: i32) -> (i32, i32) {
    %c0_i32 = arith.constant 0 : i32
    %c0_i32_0 = arith.constant 0 : i32
    return %arg0, %c0_i32 : i32, i32
  }
  func.func @transform_5(%arg0: i32, %arg1: i32) -> (i32, i32) {
    %c0_i32 = arith.constant 0 : i32
    %c0_i32_0 = arith.constant 0 : i32
    %c0_i32_1 = arith.constant 0 : i32
    return %c0_i32, %c0_i32_0 : i32, i32
  }
  func.func @transform_6(%arg0: i32, %arg1: i32) -> (i32, i32) {
    %c0_i32 = arith.constant 0 : i32
    %c0_i32_0 = arith.constant 0 : i32
    %c0_i32_1 = arith.constant 0 : i32
    return %c0_i32, %c0_i32_0 : i32, i32
  }
  func.func @transform_7(%arg0: i32, %arg1: i32) -> (i32, i32) {
    %c0_i32 = arith.constant 0 : i32
    %c0_i32_0 = arith.constant 0 : i32
    %c0_i32_1 = arith.constant 0 : i32
    return %c0_i32, %c0_i32_0 : i32, i32
  }
  func.func @transform_8(%arg0: i32, %arg1: i32) -> (i32, i32) {
    %c0_i32 = arith.constant 0 : i32
    %c0_i32_0 = arith.constant 0 : i32
    %c0_i32_1 = arith.constant 0 : i32
    return %c0_i32, %c0_i32_0 : i32, i32
  }
  func.func @transform_9(%arg0: i32, %arg1: i32) -> (i32, i32) {
    %c0_i32 = arith.constant 0 : i32
    %c0_i32_0 = arith.constant 0 : i32
    return %arg0, %c0_i32 : i32, i32
  }
}

</mosaic_0001>

<bundles_post_ra>
// kernel: adaptive_sampler_scores.1
= control target key start
LH: loop header
LB: loop body
LE: loop exit
PB: predicated region body
PF: predicated region fallthrough
CT: control target
= control target key end

     0   :  { %v382_v0 = vlaneseq  ;;  %v1974_v1 = vmov 0   ;;  %v1975_v52 = vmov 0.0   ;;  %vm712_vm2 = vcmask 64512   ;;  %s3317_s4 = inlined_call_operand.vmem [shape: s32[128,1], index: 4, kind: input, shape index: {}]   ;;  %s3318_s5 = inlined_call_operand.vmem [shape: f32[2,128], index: 5, kind: input, shape index: {}]   ;;  %s3319_s6 = inlined_call_operand.vmem [shape: f32[2,128], index: 6, kind: input, shape index: {}]   ;;  %s3320_s3 = inlined_call_operand.vmem [shape: f32[8,128], index: 3, kind: input, shape index: {}]   ;;  %s3321_s1 = inlined_call_operand.vmem [shape: bf16[128,128], index: 1, kind: input, shape index: {}]   ;;  %s3322_s2 = inlined_call_operand.vmem [shape: bf16[128,128], index: 2, kind: input, shape index: {}]   ;;  %s3323_s7 = inlined_call_operand.vmem [shape: f32[2,128], index: 7, kind: input, shape index: {}]   ;;  %s3324_s8 = inlined_call_operand.vmem [shape: f32[2,128], index: 8, kind: input, shape index: {}]   ;;  %s3325_s0 = inlined_call_operand.vmem [shape: f32[128,128], index: 0, kind: input, shape index: {}]   ;;  %s3326_s9 = inlined_call_operand.vmem [shape: f32[128,128], index: 9, kind: output, shape index: {}]  }
   0x1   :  { %1820 = vset.pattern.permute.xlu1 %v1974_v1  ;;  %v366_v2 = vld [vmem:[%s3317_s4] sm:$0xff]  ;;  %1821 = vset.pattern.permute.xlu0 %v1974_v1  ;;  %v367_v4 = vld [vmem:[%s3317_s4 + $0x8] sm:$0xff]  ;;  %v369_v12 = vld [vmem:[%s3317_s4 + $0x18] sm:$0xff]  ;;  %vm737_vm10 = vcmask 1043456  }
   0x2   :  { %385 = vperm.xlu1 %1820, %v366_v2   ;;  %v473_v3 = vshrl.u32 %v382_v0, 7  ;;  %v362_v5 = vld [vmem:[%s3318_s5] sm:$0x3]  ;;  %v1823_v18 = vld [vmem:[%s3321_s1 + $0x8] sm:$0xff]   ;;  %v1824_v23 = vld [vmem:[%s3321_s1 + $0x10] sm:$0xff]   ;;  %v2149_v50 = vand.u32 127, %v382_v0 }
   0x3   :  { %v363_v6 = vld [vmem:[%s3319_s6] sm:$0x3]  ;;  %v371_v24 = vld [vmem:[%s3317_s4 + $0x28] sm:$0xff]  ;;  %v1825_v26 = vld [vmem:[%s3321_s1 + $0x18] sm:$0xff]  }
   0x4   :  { %v2039_v7 = vsub.s32 0, %v473_v3  ;;  %v2041_v8 = vsub.s32 1, %v473_v3  ;;  %v361_v9 = vld [vmem:[%s3320_s3] sm:$0xff]  ;;  %v372_v28 = vld [vmem:[%s3317_s4 + $0x30] sm:$0xff]  ;;  %v373_v30 = vld [vmem:[%s3317_s4 + $0x38] sm:$0xff] }
   0x5   :  { %v1822_v16 = vld [vmem:[%s3321_s1] sm:$0xff]   ;;  %v1827_v31 = vld [vmem:[%s3321_s1 + $0x28] sm:$0xff]   ;;  %v1828_v33 = vld [vmem:[%s3321_s1 + $0x30] sm:$0xff]  }
   0x6   :  { %388 = vperm.xlu1 %1820, %v367_v4   ;;  %v475_v10 = vrot.slane %v362_v5, %v2039_v7  ;;  %v480_v11 = vrot.slane %v363_v6, %v2039_v7  ;;  %v1067_v13 = vrot.slane %v362_v5, %v2041_v8  ;;  %v1072_v14 = vrot.slane %v363_v6, %v2041_v8  ;;  %v370_v20 = vld [vmem:[%s3317_s4 + $0x20] sm:$0xff]  ;;  %v375_v34 = vld [vmem:[%s3317_s4 + $0x48] sm:$0xff]  ;;  %v1829_v35 = vld [vmem:[%s3321_s1 + $0x38] sm:$0xff]  }
   0x7   :  { %1748 = vmatprep.subr.bf16.mxu0 %v1822_v16  ;;  %v1830_v27 = vld [vmem:[%s3322_s2] sm:$0xff]   ;;  %v376_v36 = vld [vmem:[%s3317_s4 + $0x50] sm:$0xff]  ;;  %v1831_v38 = vld [vmem:[%s3322_s2 + $0x8] sm:$0xff]  }
   0x8   :  { %v476_v15 = vmul.f32 %v475_v10, %v361_v9  ;;  %v1068_v17 = vmul.f32 %v1067_v13, %v361_v9  ;;  %1749 = vmatpush3.bf16.msra.mxu0 %v1822_v16  ;;  %1764 = vmatprep.mubr.bf16.mxu0 %v1830_v27  ;;  %v1826_v29 = vld [vmem:[%s3321_s1 + $0x20] sm:$0xff]   ;;  %v368_v37 = vld [vmem:[%s3317_s4 + $0x10] sm:$0xff]  ;;  %v377_v39 = vld [vmem:[%s3317_s4 + $0x58] sm:$0xff] }
   0x9   :  { %1750 = vmatprep.subr.bf16.mxu0 %v1823_v18  ;;  %v374_v32 = vld [vmem:[%s3317_s4 + $0x40] sm:$0xff]  ;;  %v1832_v40 = vld [vmem:[%s3322_s2 + $0x10] sm:$0xff]   ;;  %v1833_v43 = vld [vmem:[%s3322_s2 + $0x18] sm:$0xff]  }
   0xa   :  { %394 = vperm.xlu1 %1820, %v369_v12   ;;  %v2059_v19 = vadd.f32 %v480_v11, %v476_v15  ;;  %v2064_v21 = vadd.f32 %v1072_v14, %v1068_v17  ;;  %v380_v41 = vld [vmem:[%s3317_s4 + $0x70] sm:$0xff]  ;;  %v378_v42 = vld [vmem:[%s3317_s4 + $0x60] sm:$0xff]  ;;  %v379_v44 = vld [vmem:[%s3317_s4 + $0x68] sm:$0xff] }
   0xb   :  { %v1834_v45 = vld [vmem:[%s3322_s2 + $0x20] sm:$0xff]   ;;  %v381_v46 = vld [vmem:[%s3317_s4 + $0x78] sm:$0xff]  ;;  %v1835_v47 = vld [vmem:[%s3322_s2 + $0x28] sm:$0xff]  }
   0xc   :  { %v482_v22 = vmul.f32 %v2059_v19, %v2059_v19  ;;  %v1074_v25 = vmul.f32 %v2064_v21, %v2064_v21  ;;  %1751 = vmatpush3.bf16.msra.mxu0 %v1823_v18  ;;  %v1836_v48 = vld [vmem:[%s3322_s2 + $0x30] sm:$0xff]   ;;  %v1837_v49 = vld [vmem:[%s3322_s2 + $0x38] sm:$0xff]  }
   0xd   :  { %1752 = vmatprep.subr.bf16.mxu0 %v1824_v23 }
   0xe   :  { %397 = vperm.xlu1 %1820, %v370_v20   ;;  %483 = vadd.xlane.f32.xlu0 %v482_v22 }
  0x10   :  { %1753 = vmatpush3.bf16.msra.mxu0 %v1824_v23 }
  0x11   :  { %1754 = vmatprep.subr.bf16.mxu0 %v1825_v26 }
  0x12   :  { %400 = vperm.xlu1 %1820, %v371_v24   ;;  %1075 = vadd.xlane.f32.xlu0 %v1074_v25 }
  0x14   :  { %1755 = vmatpush3.bf16.msra.mxu0 %v1825_v26 }
  0x15   :  { %1756 = vmatprep.subr.bf16.mxu0 %v1826_v29 }
  0x16   :  { %403 = vperm.xlu1 %1820, %v372_v28  }
  0x18   :  { %1757 = vmatpush3.bf16.msra.mxu0 %v1826_v29 }
  0x19   :  { %1758 = vmatprep.subr.bf16.mxu0 %v1827_v31 }
  0x1a   :  { %406 = vperm.xlu1 %1820, %v373_v30  }
  0x1c   :  { %1759 = vmatpush3.bf16.msra.mxu0 %v1827_v31 }
  0x1d   :  { %1760 = vmatprep.subr.bf16.mxu0 %v1828_v33 }
  0x1e   :  { %409 = vperm.xlu1 %1820, %v374_v32  }
  0x20   :  { %1761 = vmatpush3.bf16.msra.mxu0 %v1828_v33 }
  0x21   :  { %1762 = vmatprep.subr.bf16.mxu0 %v1829_v35 }
  0x22   :  { %412 = vperm.xlu1 %1820, %v375_v34  }
  0x24   :  { %1763 = vmatpush3.bf16.msra.mxu0 %v1829_v35 }
  0x26   :  { %415 = vperm.xlu1 %1820, %v376_v36  }
  0x27   :  { %1765 = vmatmul.mubr.bf16.vlgmr.msra.gmra.mrb[0].mxu0 %v1831_v38 }
  0x28   :  { %391 = vperm.xlu0 %1821, %v368_v37   ;;  %1768 = vmatprep.mubr.bf16.mxu0 %v1832_v40 }
  0x2a   :  { %418 = vperm.xlu1 %1820, %v377_v39  }
  0x2c   :  { %427 = vperm.xlu0 %1821, %v380_v41  }
  0x2e   :  { %421 = vperm.xlu1 %1820, %v378_v42  }
  0x2f   :  { %1769 = vmatmul.mubr.bf16.gmra.mrb[4].mxu0 %v1833_v43 }
  0x30   :  { %1772 = vmatprep.mubr.bf16.mxu0 %v1834_v45 }
  0x32   :  { %424 = vperm.xlu1 %1820, %v379_v44  }
  0x36   :  { %430 = vperm.xlu1 %1820, %v381_v46  }
  0x37   :  { %1773 = vmatmul.mubr.bf16.gmra.mrb[8].mxu0 %v1835_v47 }
  0x38   :  { %1776 = vmatprep.mubr.bf16.mxu0 %v1836_v48 }
  0x3f   :  { %1777 = vmatmul.mubr.bf16.gmra.mrb[12].mxu0 %v1837_v49 }
  0x81   :  { %v386_v51 = vpop.permute.xlu1 %385 }
  0x82   :  { %vm432_vm0 = vcmp.eq.s32.totalorder %v2149_v50, %v386_v51 }
  0x83   :  { %v448_v53 = vsel %vm432_vm0, 1.0, %v1975_v52 }
  0x85   :  { %v389_v54 = vpop.permute.xlu1 %388 }
  0x86   :  { %vm433_vm1 = vcmp.eq.s32.totalorder %v2149_v50, %v389_v54  ;;  %v365_v54 = vld [vmem:[%s3324_s8] sm:$0x3] }
  0x87   :  { %v449_v55 = vsel %vm433_vm1, 1.0, %v1975_v52 }
  0x88   :  { %v2155_v56 = vpack.c.bf16 %v449_v55, %v448_v53 }
  0x89   :  { %v395_v57 = vpop.permute.xlu1 %394 }
  0x8a   :  { %1782 = vmatprep.mubr.msk.bf16.mxu1 %vm712_vm2, %v2155_v56  ;;  %vm435_vm11 = vcmp.eq.s32.totalorder %v2149_v50, %v395_v57  ;;  %v331_v57 = vld [vmem:[%s3325_s0 + $0x10] sm:$0xff] }
  0x8b   :  { %v451_v29 = vsel %vm435_vm11, 1.0, %v1975_v52 }
  0x8d   :  { %v398_v58 = vpop.permute.xlu1 %397 }
  0x8e   :  { %vm436_vm8 = vcmp.eq.s32.totalorder %v2149_v50, %v398_v58  ;;  %v2225_v58 = vrot.slane %v365_v54, %v2039_v7 }
  0x8f   :  { %v452_v26 = vsel %vm436_vm8, 1.0, %v1975_v52 }
  0x91   :  { %v401_v59 = vpop.permute.xlu1 %400 }
  0x92   :  { %vm437_vm9 = vcmp.eq.s32.totalorder %v2149_v50, %v401_v59  ;;  %v2228_v59 = vrot.slane %v365_v54, %v2041_v8 }
  0x93   :  { %v453_v27 = vsel %vm437_vm9, 1.0, %v1975_v52 }
  0x94   :  { %v466_v32 = vpack.c.bf16 %v453_v27, %v452_v26  ;;  %v336_v26 = vld [vmem:[%s3325_s0 + $0x38] sm:$0xff] }
  0x95   :  { %v404_v61 = vpop.permute.xlu1 %403 }
  0x96   :  { %vm438_vm12 = vcmp.eq.s32.totalorder %v2149_v50, %v404_v61  ;;  %v332_v61 = vld [vmem:[%s3325_s0 + $0x18] sm:$0xff] }
  0x99   :  { %v407_v63 = vpop.permute.xlu1 %406 }
  0x9a   :  { %vm439_vm13 = vcmp.eq.s32.totalorder %v2149_v50, %v407_v63 }
  0x9b   :  { %v484_v60 = vpop.xlane.xlu0 %483  ;;  %v455_v35 = vsel %vm439_vm13, 1.0, %v1975_v52 }
  0x9c   :  { %1838 = vrsqrt.f32 %v484_v60  ;;  %vm487_vm3 = vcmp.eq.f32.partialorder %v484_v60, inf  ;;  %v490_v2 = vand.u32 2147483648, %v484_v60  ;;  %vm489_vm4 = vcmp.eq.f32.partialorder %v484_v60, 0.0 }
  0x9d   :  { %v410_v3 = vpop.permute.xlu1 %409 }
  0x9e   :  { %vm440_vm15 = vcmp.eq.s32.totalorder %v2149_v50, %v410_v3 }
  0x9f   :  { %v1076_v62 = vpop.xlane.xlu0 %1075  ;;  %v456_v38 = vsel %vm440_vm15, 1.0, %v1975_v52 }
  0xa0   :  { %1840 = vrsqrt.f32 %v1076_v62  ;;  %vm1079_vm5 = vcmp.eq.f32.partialorder %v1076_v62, inf  ;;  %v1082_v6 = vand.u32 2147483648, %v1076_v62  ;;  %vm1081_vm6 = vcmp.eq.f32.partialorder %v1076_v62, 0.0 }
  0xa1   :  { %v413_v14 = vpop.permute.xlu1 %412 }
  0xa2   :  { %vm441_vm14 = vcmp.eq.s32.totalorder %v2149_v50, %v413_v14 }
  0xa3   :  { %v457_v36 = vsel %vm441_vm14, 1.0, %v1975_v52 }
  0xa4   :  { %v468_v40 = vpack.c.bf16 %v457_v36, %v456_v38 }
  0xa5   :  { %v416_v16 = vpop.permute.xlu1 %415 }
  0xa6   :  { %v1839_v0 = vpop.eup %1838 }
  0xa7   :  { %v486_v1 = vmul.f32 %v1839_v0, %v484_v60  ;;  %v392_v17 = vpop.permute.xlu0 %391 }
  0xa8   :  { %vm434_vm7 = vcmp.eq.s32.totalorder %v2149_v50, %v392_v17 }
  0xa9   :  { %v488_v4 = vsel %vm487_vm3, %v484_v60, %v486_v1  ;;  %v419_v22 = vpop.permute.xlu1 %418  ;;  %v450_v25 = vsel %vm434_vm7, 1.0, %v1975_v52  ;;  %vm442_vm3 = vcmp.eq.s32.totalorder %v2149_v50, %v416_v16  ;;  %v329_v60 = vld [vmem:[%s3325_s0] sm:$0xff] }
  0xaa   :  { %v1841_v5 = vpop.eup %1840  ;;  %v491_v9 = vsel %vm489_vm4, %v490_v2, %v488_v4  ;;  %v465_v30 = vpack.c.bf16 %v451_v29, %v450_v25  ;;  %vm443_vm0 = vcmp.eq.s32.totalorder %v2149_v50, %v419_v22  ;;  %v458_v43 = vsel %vm442_vm3, 1.0, %v1975_v52 }
  0xab   :  { %v1078_v10 = vmul.f32 %v1841_v5, %v1076_v62  ;;  %v492_v11 = vmax.f32 %v491_v9, 1e-06  ;;  %v459_v41 = vsel %vm443_vm0, 1.0, %v1975_v52  ;;  %v428_v45 = vpop.permute.xlu0 %427 }
  0xac   :  { %v469_v46 = vpack.c.bf16 %v459_v41, %v458_v43 }
  0xad   :  { %v1080_v12 = vsel %vm1079_vm5, %v1076_v62, %v1078_v10  ;;  %1842 = vrcp.f32 %v492_v11  ;;  %v422_v33 = vpop.permute.xlu1 %421 }
  0xae   :  { %v1083_v13 = vsel %vm1081_vm6, %v1082_v6, %v1080_v12  ;;  %vm444_vm4 = vcmp.eq.s32.totalorder %v2149_v50, %v422_v33  ;;  %vm446_vm6 = vcmp.eq.s32.totalorder %v2149_v50, %v428_v45 }
  0xaf   :  { %v1084_v15 = vmax.f32 %v1083_v13, 1e-06  ;;  %v460_v47 = vsel %vm444_vm4, 1.0, %v1975_v52  ;;  %v462_v51 = vsel %vm446_vm6, 1.0, %v1975_v52 }
  0xb1   :  { %1844 = vrcp.f32 %v1084_v15  ;;  %v425_v39 = vpop.permute.xlu1 %424 }
  0xb2   :  { %vm445_vm1 = vcmp.eq.s32.totalorder %v2149_v50, %v425_v39 }
  0xb3   :  { %v461_v42 = vsel %vm445_vm1, 1.0, %v1975_v52 }
  0xb4   :  { %v470_v48 = vpack.c.bf16 %v461_v42, %v460_v47 }
  0xb5   :  { %v431_v44 = vpop.permute.xlu1 %430 }
  0xb6   :  { %vm447_vm5 = vcmp.eq.s32.totalorder %v2149_v50, %v431_v44 }
  0xb7   :  { %v1843_v18 = vpop.eup %1842  ;;  %v463_v49 = vsel %vm447_vm5, 1.0, %v1975_v52 }
  0xb8   :  { %v494_v20 = vmul.f32 %v1843_v18, %v2059_v19  ;;  %v471_v53 = vpack.c.bf16 %v463_v49, %v462_v51 }
  0xba   :  { %v495_v23 = vpack.c.bf16 %v494_v20, %v494_v20  ;;  %v335_v20 = vld [vmem:[%s3325_s0 + $0x30] sm:$0xff] }
  0xbb   :  { %v1845_v24 = vpop.eup %1844 }
  0xbc   :  { %1816 = vmatprep.subr.msk.bf16.mxu1 %vm737_vm10, %v495_v23  ;;  %v739_v19 = vsel %vm737_vm10, %v495_v23, 0  ;;  %v1086_v28 = vmul.f32 %v1845_v24, %v2064_v21  ;;  %v454_v21 = vsel %vm438_vm12, 1.0, %v1975_v52  ;;  %v364_v52 = vld [vmem:[%s3323_s7] sm:$0x3] }
  0xbd   :  { %1781 = vmatpush3.bf16.msra.mxu1 %v739_v19  ;;  %v467_v37 = vpack.c.bf16 %v455_v35, %v454_v21  ;;  %v2215_v55 = vrot.slane %v364_v52, %v2039_v7  ;;  %v330_v7 = vld [vmem:[%s3325_s0 + $0x8] sm:$0xff] }
  0xbe   :  { %v1087_v31 = vpack.c.bf16 %v1086_v28, %v1086_v28 }
  0xbf   :  { %v502_v62 = vmul.f32 %v2215_v55, %v331_v57  ;;  %v503_v5 = vmul.f32 %v2215_v55, %v332_v61  ;;  %v501_v12 = vmul.f32 %v2215_v55, %v330_v7  ;;  %v507_v36 = vmul.f32 %v2215_v55, %v336_v26 }
  0xc0   :  { %1783 = vmatmul.mubr.msk.bf16.vlgmr.msra.gmra.mrb[0].mxu1 %vm712_vm2, %v465_v30  ;;  %1817 = vmatprep.subr.msk.bf16.mxu1 %vm737_vm10, %v1087_v31  ;;  %v1305_v34 = vsel %vm737_vm10, %v1087_v31, 0  ;;  %v334_v31 = vld [vmem:[%s3325_s0 + $0x28] sm:$0xff] }
  0xc1   :  { %1786 = vmatprep.mubr.msk.bf16.mxu1 %vm712_vm2, %v466_v32  ;;  %1799 = vmatpush3.bf16.msra.mxu1 %v1305_v34  ;;  %v506_v34 = vmul.f32 %v2215_v55, %v335_v20  ;;  %v505_v41 = vmul.f32 %v2215_v55, %v334_v31 }
  0xc8   :  { %1787 = vmatmul.mubr.msk.bf16.gmra.mrb[4].mxu1 %vm712_vm2, %v467_v37 }
  0xc9   :  { %1790 = vmatprep.mubr.msk.bf16.mxu1 %vm712_vm2, %v468_v40 }
  0xd0   :  { %1791 = vmatmul.mubr.msk.bf16.gmra.mrb[8].mxu1 %vm712_vm2, %v469_v46 }
  0xd1   :  { %1794 = vmatprep.mubr.msk.bf16.mxu1 %vm712_vm2, %v470_v48 }
  0xd8   :  { %1795 = vmatmul.mubr.msk.bf16.gmra.mrb[12].mxu1 %vm712_vm2, %v471_v53 }
  0xd9   :  { %1800 = vmatprep.mubr.msk.bf16.mxu1 %vm712_vm2, %v2155_v56  ;;  %v2218_v56 = vrot.slane %v364_v52, %v2041_v8  ;;  %v500_v8 = vmul.f32 %v2215_v55, %v329_v60 }
  0xdb   :  { %v1094_v63 = vmul.f32 %v2218_v56, %v331_v57  ;;  %v1092_v1 = vmul.f32 %v2218_v56, %v329_v60  ;;  %v1095_v6 = vmul.f32 %v2218_v56, %v332_v61  ;;  %v1093_v13 = vmul.f32 %v2218_v56, %v330_v7  ;;  %v339_v61 = vld [vmem:[%s3325_s0 + $0x50] sm:$0xff] }
  0xdc   :  { %v1098_v38 = vmul.f32 %v2218_v56, %v335_v20  ;;  %v1099_v39 = vmul.f32 %v2218_v56, %v336_v26 }
  0xe0   :  { %1801 = vmatmul.mubr.msk.bf16.vlgmr.msra.gmra.mrb[16].mxu1 %vm712_vm2, %v465_v30  ;;  %v333_v30 = vld [vmem:[%s3325_s0 + $0x20] sm:$0xff] }
  0xe1   :  { %1804 = vmatprep.mubr.msk.bf16.mxu1 %vm712_vm2, %v466_v32  ;;  %v1096_v45 = vmul.f32 %v2218_v56, %v333_v30 }
  0xe8   :  { %1805 = vmatmul.mubr.msk.bf16.gmra.mrb[20].mxu1 %vm712_vm2, %v467_v37 }
  0xe9   :  { %1808 = vmatprep.mubr.msk.bf16.mxu1 %vm712_vm2, %v468_v40  ;;  %v504_v40 = vmul.f32 %v2215_v55, %v333_v30 }
  0xf0   :  { %1809 = vmatmul.mubr.msk.bf16.gmra.mrb[24].mxu1 %vm712_vm2, %v469_v46  ;;  %v1097_v46 = vmul.f32 %v2218_v56, %v334_v31 }
  0xf1   :  { %1812 = vmatprep.mubr.msk.bf16.mxu1 %vm712_vm2, %v470_v48 }
  0xf8   :  { %1813 = vmatmul.mubr.msk.bf16.gmra.mrb[28].mxu1 %vm712_vm2, %v471_v53 }
  0xfa   :  { %v1766_v0 = vpop.f32.mrb[0].mxu0 }
  0xfb   :  { %v522_v2 = vmul.f32 %v1766_v0, %v2225_v58  ;;  %v1114_v3 = vmul.f32 %v1766_v0, %v2228_v59  ;;  %v231_v4 = vpop.f32.mrb[1].mxu0 }
  0xfc   :  { %v520_v9 = vmul.f32 %v2225_v58, %v231_v4  ;;  %v1112_v10 = vmul.f32 %v2228_v59, %v231_v4  ;;  %v1767_v11 = vpop.f32.mrb[2].mxu0  ;;  %v337_v4 = vld [vmem:[%s3325_s0 + $0x40] sm:$0xff] }
  0xfd   :  { %v2251_v14 = vadd.f32 %v522_v2, %v502_v62  ;;  %v523_v15 = vmul.f32 %v1767_v11, %v2225_v58  ;;  %v1115_v16 = vmul.f32 %v1767_v11, %v2228_v59  ;;  %v2255_v17 = vadd.f32 %v1114_v3, %v1094_v63  ;;  %v234_v18 = vpop.f32.mrb[3].mxu0 }
  0xfe   :  { %v2260_v22 = vadd.f32 %v520_v9, %v500_v8  ;;  %v521_v23 = vmul.f32 %v2225_v58, %v234_v18  ;;  %v1113_v24 = vmul.f32 %v2228_v59, %v234_v18  ;;  %v2264_v25 = vadd.f32 %v1112_v10, %v1092_v1  ;;  %v340_v8 = vld [vmem:[%s3325_s0 + $0x58] sm:$0xff] }
  0xff   :  { %v554_v27 = vmul.f32 %v2251_v14, %v2251_v14  ;;  %v1146_v19 = vmul.f32 %v2255_v17, %v2255_v17  ;;  %v2273_v28 = vadd.f32 %v523_v15, %v503_v5  ;;  %v2275_v29 = vadd.f32 %v1115_v16, %v1095_v6  ;;  %v338_v5 = vld [vmem:[%s3325_s0 + $0x48] sm:$0xff] }
 0x100   :  { %v2283_v32 = vadd.f32 %v521_v23, %v501_v12  ;;  %v2285_v33 = vadd.f32 %v1113_v24, %v1093_v13  ;;  %v552_v21 = vmul.f32 %v2260_v22, %v2260_v22  ;;  %v1144_v35 = vmul.f32 %v2264_v25, %v2264_v25 }
 0x101   :  { %572 = vadd.xlane.f32.xlu0 %v554_v27  ;;  %1164 = vadd.xlane.f32.xlu1 %v1146_v19  ;;  %v555_v47 = vmul.f32 %v2273_v28, %v2273_v28  ;;  %v510_v10 = vmul.f32 %v2215_v55, %v339_v61  ;;  %v1147_v11 = vmul.f32 %v2275_v29, %v2275_v29 }
 0x102   :  { %v1770_v37 = vpop.f32.mrb[4].mxu0  ;;  %v553_v53 = vmul.f32 %v2283_v32, %v2283_v32  ;;  %v511_v13 = vmul.f32 %v2215_v55, %v340_v8  ;;  %v1102_v16 = vmul.f32 %v2218_v56, %v339_v61  ;;  %v1103_v18 = vmul.f32 %v2218_v56, %v340_v8 }
 0x103   :  { %v526_v42 = vmul.f32 %v1770_v37, %v2225_v58  ;;  %v1118_v43 = vmul.f32 %v1770_v37, %v2228_v59  ;;  %v247_v44 = vpop.f32.mrb[5].mxu0  ;;  %v508_v20 = vmul.f32 %v2215_v55, %v337_v4  ;;  %v509_v23 = vmul.f32 %v2215_v55, %v338_v5 }
 0x104   :  { %v524_v48 = vmul.f32 %v2225_v58, %v247_v44  ;;  %v1116_v49 = vmul.f32 %v2228_v59, %v247_v44  ;;  %v1771_v51 = vpop.f32.mrb[6].mxu0  ;;  %v1100_v19 = vmul.f32 %v2218_v56, %v337_v4  ;;  %v1101_v30 = vmul.f32 %v2218_v56, %v338_v5 }
 0x105   :  { %568 = vadd.xlane.f32.xlu0 %v552_v21  ;;  %1160 = vadd.xlane.f32.xlu1 %v1144_v35  ;;  %v527_v52 = vmul.f32 %v1771_v51, %v2225_v58  ;;  %v1119_v54 = vmul.f32 %v1771_v51, %v2228_v59  ;;  %v2309_v57 = vadd.f32 %v526_v42, %v506_v34  ;;  %v250_v60 = vpop.f32.mrb[7].mxu0  ;;  %v342_v51 = vld [vmem:[%s3325_s0 + $0x68] sm:$0xff] }
 0x106   :  { %v525_v62 = vmul.f32 %v2225_v58, %v250_v60  ;;  %v1117_v63 = vmul.f32 %v2228_v59, %v250_v60  ;;  %v2316_v7 = vadd.f32 %v1118_v43, %v1098_v38  ;;  %v2318_v0 = vadd.f32 %v524_v48, %v504_v40 }
 0x107   :  { %v2323_v1 = vadd.f32 %v527_v52, %v507_v36  ;;  %v2325_v2 = vadd.f32 %v1119_v54, %v1099_v39  ;;  %v2327_v3 = vadd.f32 %v1116_v49, %v1096_v45  ;;  %v558_v12 = vmul.f32 %v2309_v57, %v2309_v57 }
 0x108   :  { %v2335_v6 = vadd.f32 %v525_v62, %v505_v41  ;;  %v2337_v9 = vadd.f32 %v1117_v63, %v1097_v46  ;;  %v1145_v31 = vmul.f32 %v2285_v33, %v2285_v33  ;;  %v1150_v34 = vmul.f32 %v2316_v7, %v2316_v7  ;;  %v343_v41 = vld [vmem:[%s3325_s0 + $0x70] sm:$0xff]  ;;  %v344_v46 = vld [vmem:[%s3325_s0 + $0x78] sm:$0xff] }
 0x109   :  { %574 = vadd.xlane.f32.xlu0 %v555_v47  ;;  %570 = vadd.xlane.f32.xlu1 %v553_v53  ;;  %v341_v53 = vld [vmem:[%s3325_s0 + $0x60] sm:$0xff]  ;;  %v514_v60 = vmul.f32 %v2215_v55, %v343_v41  ;;  %v559_v61 = vmul.f32 %v2323_v1, %v2323_v1  ;;  %v556_v62 = vmul.f32 %v2318_v0, %v2318_v0 }
 0x10a   :  { %v1774_v15 = vpop.f32.mrb[8].mxu0  ;;  %v515_v63 = vmul.f32 %v2215_v55, %v344_v46  ;;  %v513_v4 = vmul.f32 %v2215_v55, %v342_v51  ;;  %v1106_v5 = vmul.f32 %v2218_v56, %v343_v41 }
 0x10b   :  { %v530_v24 = vmul.f32 %v1774_v15, %v2225_v58  ;;  %v1122_v26 = vmul.f32 %v1774_v15, %v2228_v59  ;;  %v263_v27 = vpop.f32.mrb[9].mxu0 }
 0x10c   :  { %v528_v21 = vmul.f32 %v2225_v58, %v263_v27  ;;  %v1120_v35 = vmul.f32 %v2228_v59, %v263_v27  ;;  %v1775_v36 = vpop.f32.mrb[10].mxu0 }
 0x10d   :  { %1166 = vadd.xlane.f32.xlu0 %v1147_v11  ;;  %580 = vadd.xlane.f32.xlu1 %v558_v12  ;;  %v531_v37 = vmul.f32 %v1775_v36, %v2225_v58  ;;  %v1123_v38 = vmul.f32 %v1775_v36, %v2228_v59  ;;  %v2361_v39 = vadd.f32 %v530_v24, %v510_v10  ;;  %v266_v40 = vpop.f32.mrb[11].mxu0 }
 0x10e   :  { %v529_v42 = vmul.f32 %v2225_v58, %v266_v40  ;;  %v1121_v43 = vmul.f32 %v2228_v59, %v266_v40  ;;  %v2368_v44 = vadd.f32 %v1122_v26, %v1102_v16  ;;  %v2370_v45 = vadd.f32 %v528_v21, %v508_v20 }
 0x10f   :  { %v2375_v47 = vadd.f32 %v531_v37, %v511_v13  ;;  %v2377_v48 = vadd.f32 %v1123_v38, %v1103_v18  ;;  %v2379_v49 = vadd.f32 %v1120_v35, %v1100_v19  ;;  %v1107_v10 = vmul.f32 %v2218_v56, %v344_v46 }
 0x110   :  { %v2387_v52 = vadd.f32 %v529_v42, %v509_v23  ;;  %v2389_v54 = vadd.f32 %v1121_v43, %v1101_v30  ;;  %v512_v11 = vmul.f32 %v2215_v55, %v341_v53  ;;  %v1105_v16 = vmul.f32 %v2218_v56, %v342_v51 }
 0x111   :  { %1162 = vadd.xlane.f32.xlu0 %v1145_v31  ;;  %1172 = vadd.xlane.f32.xlu1 %v1150_v34  ;;  %v1104_v18 = vmul.f32 %v2218_v56, %v341_v53  ;;  %v1151_v20 = vmul.f32 %v2325_v2, %v2325_v2  ;;  %v1148_v23 = vmul.f32 %v2327_v3, %v2327_v3 }
 0x112   :  { %v1778_v8 = vpop.f32.mrb[12].mxu0  ;;  %v1149_v42 = vmul.f32 %v2337_v9, %v2337_v9  ;;  %v1154_v43 = vmul.f32 %v2368_v44, %v2368_v44  ;;  %v563_v46 = vmul.f32 %v2375_v47, %v2375_v47  ;;  %v560_v51 = vmul.f32 %v2370_v45, %v2370_v45 }
 0x113   :  { %v534_v12 = vmul.f32 %v1778_v8, %v2225_v58  ;;  %v1126_v13 = vmul.f32 %v1778_v8, %v2228_v59  ;;  %v279_v15 = vpop.f32.mrb[13].mxu0  ;;  %v1155_v53 = vmul.f32 %v2377_v48, %v2377_v48 }
 0x114   :  { %v532_v24 = vmul.f32 %v2225_v58, %v279_v15  ;;  %v1124_v26 = vmul.f32 %v2228_v59, %v279_v15  ;;  %v1779_v55 = vpop.f32.mrb[14].mxu0 }
 0x115   :  { %582 = vadd.xlane.f32.xlu0 %v559_v61  ;;  %576 = vadd.xlane.f32.xlu1 %v556_v62  ;;  %v535_v27 = vmul.f32 %v1779_v55, %v2225_v58  ;;  %v1127_v19 = vmul.f32 %v1779_v55, %v2228_v59  ;;  %v2413_v30 = vadd.f32 %v534_v12, %v514_v60  ;;  %v282_v56 = vpop.f32.mrb[15].mxu0 }
 0x116   :  { %v533_v31 = vmul.f32 %v2225_v58, %v282_v56  ;;  %v1125_v34 = vmul.f32 %v2228_v59, %v282_v56  ;;  %v2417_v21 = vadd.f32 %v1126_v13, %v1106_v5  ;;  %v2419_v35 = vadd.f32 %v532_v24, %v512_v11 }
 0x117   :  { %v2421_v36 = vadd.f32 %v535_v27, %v515_v63  ;;  %v2423_v37 = vadd.f32 %v1127_v19, %v1107_v10  ;;  %v2425_v38 = vadd.f32 %v1124_v26, %v1104_v18  ;;  %v557_v58 = vmul.f32 %v2335_v6, %v2335_v6 }
 0x118   :  { %v2427_v40 = vadd.f32 %v533_v31, %v513_v4  ;;  %v2429_v41 = vadd.f32 %v1125_v34, %v1105_v16  ;;  %v562_v59 = vmul.f32 %v2361_v39, %v2361_v39  ;;  %v1152_v60 = vmul.f32 %v2379_v49, %v2379_v49 }
 0x119   :  { %1174 = vadd.xlane.f32.xlu0 %v1151_v20  ;;  %1168 = vadd.xlane.f32.xlu1 %v1148_v23  ;;  %v561_v61 = vmul.f32 %v2387_v52, %v2387_v52  ;;  %v566_v62 = vmul.f32 %v2413_v30, %v2413_v30  ;;  %v1153_v63 = vmul.f32 %v2389_v54, %v2389_v54 }
 0x11a   :  { %v1158_v8 = vmul.f32 %v2417_v21, %v2417_v21  ;;  %v567_v4 = vmul.f32 %v2421_v36, %v2421_v36  ;;  %v564_v5 = vmul.f32 %v2419_v35, %v2419_v35  ;;  %v1159_v10 = vmul.f32 %v2423_v37, %v2423_v37 }
 0x11b   :  { %v1156_v11 = vmul.f32 %v2425_v38, %v2425_v38  ;;  %v565_v12 = vmul.f32 %v2427_v40, %v2427_v40  ;;  %v1157_v13 = vmul.f32 %v2429_v41, %v2429_v41 }
 0x11d   :  { %578 = vadd.xlane.f32.xlu0 %v557_v58  ;;  %588 = vadd.xlane.f32.xlu1 %v562_v59 }
 0x121   :  { %1170 = vadd.xlane.f32.xlu0 %v1149_v42  ;;  %1180 = vadd.xlane.f32.xlu1 %v1154_v43 }
 0x125   :  { %590 = vadd.xlane.f32.xlu0 %v563_v46  ;;  %584 = vadd.xlane.f32.xlu1 %v560_v51 }
 0x129   :  { %1182 = vadd.xlane.f32.xlu0 %v1155_v53  ;;  %1176 = vadd.xlane.f32.xlu1 %v1152_v60 }
 0x12d   :  { %586 = vadd.xlane.f32.xlu0 %v561_v61  ;;  %596 = vadd.xlane.f32.xlu1 %v566_v62 }
 0x131   :  { %1178 = vadd.xlane.f32.xlu0 %v1153_v63  ;;  %1188 = vadd.xlane.f32.xlu1 %v1158_v8 }
 0x135   :  { %598 = vadd.xlane.f32.xlu0 %v567_v4  ;;  %592 = vadd.xlane.f32.xlu1 %v564_v5 }
 0x139   :  { %1190 = vadd.xlane.f32.xlu0 %v1159_v10  ;;  %1184 = vadd.xlane.f32.xlu1 %v1156_v11 }
 0x13d   :  { %594 = vadd.xlane.f32.xlu0 %v565_v12 }
 0x141   :  { %1186 = vadd.xlane.f32.xlu0 %v1157_v13 }
 0x18e   :  { %v2482_v61 = vpop.xlane.xlu0 %572  ;;  %v2490_v5 = vpop.xlane.xlu1 %1164 }
 0x18f   :  { %1846 = vrsqrt.f32 %v2482_v61  ;;  %vm616_vm2 = vcmp.eq.f32.partialorder %v2482_v61, inf  ;;  %vm618_vm7 = vcmp.eq.f32.partialorder %v2482_v61, 0.0  ;;  %vm1208_vm8 = vcmp.eq.f32.partialorder %v2490_v5, inf }
 0x190   :  { %vm1210_vm9 = vcmp.eq.f32.partialorder %v2490_v5, 0.0 }
 0x193   :  { %v1784_v15 = vpop.f32.mrb[0].mxu1 }
 0x194   :  { %v840_v16 = vmul.f32 %v1784_v15, %v2251_v14  ;;  %v775_v18 = vpop.f32.mrb[1].mxu1 }
 0x195   :  { %v1785_v20 = vpop.f32.mrb[2].mxu1  ;;  %v838_v26 = vmul.f32 %v775_v18, %v2260_v22 }
 0x196   :  { %v841_v23 = vmul.f32 %v1785_v20, %v2273_v28  ;;  %v778_v24 = vpop.f32.mrb[3].mxu1  ;;  %858 = vadd.xlane.f32.xlu1 %v840_v16  ;;  %v2497_v16 = vpop.xlane.xlu1 %1160 }
 0x197   :  { %v839_v55 = vmul.f32 %v778_v24, %v2283_v32  ;;  %vm1194_vm13 = vcmp.eq.f32.partialorder %v2497_v16, inf }
 0x198   :  { %860 = vadd.xlane.f32.xlu0 %v841_v23 }
 0x19a   :  { %854 = vadd.xlane.f32.xlu1 %v838_v26  ;;  %v2504_v24 = vpop.xlane.xlu1 %570 }
 0x19b   :  { %v1788_v27 = vpop.f32.mrb[4].mxu1  ;;  %vm609_vm15 = vcmp.eq.f32.partialorder %v2504_v24, inf  ;;  %vm611_vm1 = vcmp.eq.f32.partialorder %v2504_v24, 0.0 }
 0x19c   :  { %v844_v19 = vmul.f32 %v1788_v27, %v2309_v57  ;;  %v791_v56 = vpop.f32.mrb[5].mxu1  ;;  %856 = vadd.xlane.f32.xlu0 %v839_v55 }
 0x19d   :  { %v1789_v31 = vpop.f32.mrb[6].mxu1  ;;  %v842_v28 = vmul.f32 %v791_v56, %v2318_v0 }
 0x19e   :  { %v845_v14 = vmul.f32 %v1789_v31, %v2323_v1  ;;  %v794_v34 = vpop.f32.mrb[7].mxu1  ;;  %866 = vadd.xlane.f32.xlu1 %v844_v19  ;;  %v2508_v27 = vpop.xlane.xlu1 %580 }
 0x19f   :  { %v843_v58 = vmul.f32 %v794_v34, %v2335_v6  ;;  %vm644_vm3 = vcmp.eq.f32.partialorder %v2508_v27, inf }
 0x1a0   :  { %868 = vadd.xlane.f32.xlu0 %v845_v14 }
 0x1a2   :  { %862 = vadd.xlane.f32.xlu1 %v842_v28  ;;  %v2516_v28 = vpop.xlane.xlu1 %1172 }
 0x1a3   :  { %v1792_v22 = vpop.f32.mrb[8].mxu1  ;;  %vm1236_vm5 = vcmp.eq.f32.partialorder %v2516_v28, inf }
 0x1a4   :  { %v848_v32 = vmul.f32 %v1792_v22, %v2361_v39  ;;  %v807_v59 = vpop.f32.mrb[9].mxu1  ;;  %864 = vadd.xlane.f32.xlu0 %v843_v58 }
 0x1a5   :  { %v1793_v42 = vpop.f32.mrb[10].mxu1  ;;  %v846_v1 = vmul.f32 %v807_v59, %v2370_v45 }
 0x1a6   :  { %v849_v57 = vmul.f32 %v1793_v42, %v2375_v47  ;;  %v810_v43 = vpop.f32.mrb[11].mxu1  ;;  %874 = vadd.xlane.f32.xlu1 %v848_v32  ;;  %v2523_v32 = vpop.xlane.xlu1 %576 }
 0x1a7   :  { %v847_v46 = vmul.f32 %v810_v43, %v2387_v52 }
 0x1a8   :  { %876 = vadd.xlane.f32.xlu0 %v849_v57 }
 0x1aa   :  { %870 = vadd.xlane.f32.xlu1 %v846_v1  ;;  %v2527_v59 = vpop.xlane.xlu1 %1168 }
 0x1ab   :  { %v1796_v0 = vpop.f32.mrb[12].mxu1 }
 0x1ac   :  { %v852_v6 = vmul.f32 %v1796_v0, %v2413_v30  ;;  %v823_v51 = vpop.f32.mrb[13].mxu1  ;;  %872 = vadd.xlane.f32.xlu0 %v847_v46 }
 0x1ad   :  { %v1797_v53 = vpop.f32.mrb[14].mxu1  ;;  %v850_v47 = vmul.f32 %v823_v51, %v2419_v35 }
 0x1ae   :  { %v853_v39 = vmul.f32 %v1797_v53, %v2421_v36  ;;  %v826_v60 = vpop.f32.mrb[15].mxu1  ;;  %882 = vadd.xlane.f32.xlu1 %v852_v6  ;;  %v2487_v36 = vpop.xlane.xlu0 %568  ;;  %v619_v6 = vand.u32 2147483648, %v2482_v61 }
 0x1af   :  { %v851_v45 = vmul.f32 %v826_v60, %v2427_v40  ;;  %vm602_vm11 = vcmp.eq.f32.partialorder %v2487_v36, inf  ;;  %vm604_vm12 = vcmp.eq.f32.partialorder %v2487_v36, 0.0 }
 0x1b0   :  { %884 = vadd.xlane.f32.xlu0 %v853_v39 }
 0x1b2   :  { %878 = vadd.xlane.f32.xlu1 %v850_v47  ;;  %v2494_v13 = vpop.xlane.xlu0 %574 }
 0x1b3   :  { %v1802_v52 = vpop.f32.mrb[16].mxu1  ;;  %1848 = vrsqrt.f32 %v2494_v13  ;;  %vm623_vm10 = vcmp.eq.f32.partialorder %v2494_v13, inf  ;;  %vm625_vm14 = vcmp.eq.f32.partialorder %v2494_v13, 0.0 }
 0x1b4   :  { %v1406_v62 = vmul.f32 %v1802_v52, %v2255_v17  ;;  %v1341_v63 = vpop.f32.mrb[17].mxu1  ;;  %880 = vadd.xlane.f32.xlu0 %v851_v45  ;;  %1850 = vrsqrt.f32 %v2490_v5  ;;  %v1211_v45 = vand.u32 2147483648, %v2490_v5 }
 0x1b5   :  { %v1803_v30 = vpop.f32.mrb[18].mxu1  ;;  %v1404_v35 = vmul.f32 %v1341_v63, %v2264_v25  ;;  %1852 = vrsqrt.f32 %v2487_v36  ;;  %v626_v63 = vand.u32 2147483648, %v2494_v13 }
 0x1b6   :  { %v1407_v8 = vmul.f32 %v1803_v30, %v2275_v29  ;;  %v1344_v4 = vpop.f32.mrb[19].mxu1  ;;  %1424 = vadd.xlane.f32.xlu1 %v1406_v62  ;;  %v2501_v20 = vpop.xlane.xlu0 %1166  ;;  %1854 = vrsqrt.f32 %v2497_v16  ;;  %v605_v62 = vand.u32 2147483648, %v2487_v36 }
 0x1b7   :  { %v1405_v40 = vmul.f32 %v1344_v4, %v2285_v33  ;;  %1856 = vrsqrt.f32 %v2504_v24  ;;  %vm1215_vm0 = vcmp.eq.f32.partialorder %v2501_v20, inf }
 0x1b8   :  { %1426 = vadd.xlane.f32.xlu0 %v1407_v8  ;;  %1858 = vrsqrt.f32 %v2501_v20 }
 0x1b9   :  { %1860 = vrsqrt.f32 %v2508_v27 }
 0x1ba   :  { %1420 = vadd.xlane.f32.xlu1 %v1404_v35 }
 0x1bb   :  { %v1806_v10 = vpop.f32.mrb[20].mxu1 }
 0x1bc   :  { %v1410_v17 = vmul.f32 %v1806_v10, %v2316_v7  ;;  %v1357_v11 = vpop.f32.mrb[21].mxu1  ;;  %1422 = vadd.xlane.f32.xlu0 %v1405_v40  ;;  %v1197_v10 = vand.u32 2147483648, %v2497_v16 }
 0x1bd   :  { %v1807_v12 = vpop.f32.mrb[22].mxu1  ;;  %v1408_v25 = vmul.f32 %v1357_v11, %v2327_v3 }
 0x1be   :  { %v1411_v29 = vmul.f32 %v1807_v12, %v2325_v2  ;;  %v1360_v15 = vpop.f32.mrb[23].mxu1  ;;  %1432 = vadd.xlane.f32.xlu1 %v1410_v17 }
 0x1bf   :  { %v1409_v33 = vmul.f32 %v1360_v15, %v2337_v9  ;;  %v2510_v9 = vpop.xlane.xlu0 %1162  ;;  %v1218_v15 = vand.u32 2147483648, %v2501_v20 }
 0x1c0   :  { %1434 = vadd.xlane.f32.xlu0 %v1411_v29  ;;  %1862 = vrsqrt.f32 %v2510_v9  ;;  %v612_v29 = vand.u32 2147483648, %v2504_v24  ;;  %vm1201_vm4 = vcmp.eq.f32.partialorder %v2510_v9, inf }
 0x1c1   :  { %1864 = vrsqrt.f32 %v2516_v28 }
 0x1c2   :  { %1428 = vadd.xlane.f32.xlu1 %v1408_v25 }
 0x1c3   :  { %v1810_v18 = vpop.f32.mrb[24].mxu1  ;;  %v2514_v34 = vpop.xlane.xlu0 %582 }
 0x1c4   :  { %v1414_v7 = vmul.f32 %v1810_v18, %v2368_v44  ;;  %v1373_v23 = vpop.f32.mrb[25].mxu1  ;;  %1430 = vadd.xlane.f32.xlu0 %v1409_v33  ;;  %1866 = vrsqrt.f32 %v2514_v34  ;;  %vm651_vm6 = vcmp.eq.f32.partialorder %v2514_v34, inf }
 0x1c5   :  { %v1811_v2 = vpop.f32.mrb[26].mxu1  ;;  %v1412_v3 = vmul.f32 %v1373_v23, %v2379_v49  ;;  %1868 = vrsqrt.f32 %v2523_v32 }
 0x1c6   :  { %v1415_v26 = vmul.f32 %v1811_v2, %v2377_v48  ;;  %v1376_v55 = vpop.f32.mrb[27].mxu1  ;;  %1440 = vadd.xlane.f32.xlu1 %v1414_v7  ;;  %v647_v7 = vand.u32 2147483648, %v2508_v27 }
 0x1c7   :  { %v1413_v19 = vmul.f32 %v1376_v55, %v2389_v54  ;;  %v2521_v22 = vpop.xlane.xlu0 %1174 }
 0x1c8   :  { %1442 = vadd.xlane.f32.xlu0 %v1415_v26  ;;  %1870 = vrsqrt.f32 %v2521_v22 }
 0x1c9   :  { %1872 = vrsqrt.f32 %v2527_v59 }
 0x1ca   :  { %1436 = vadd.xlane.f32.xlu1 %v1412_v3 }
 0x1cb   :  { %v1814_v44 = vpop.f32.mrb[28].mxu1 }
 0x1cc   :  { %v1389_v56 = vpop.f32.mrb[29].mxu1  ;;  %1438 = vadd.xlane.f32.xlu0 %v1413_v19  ;;  %v1418_v58 = vmul.f32 %v1814_v44, %v2417_v21 }
 0x1cd   :  { %v1416_v31 = vmul.f32 %v1389_v56, %v2425_v38  ;;  %v1815_v14 = vpop.f32.mrb[30].mxu1  ;;  %v2525_v38 = vpop.xlane.xlu0 %578 }
 0x1ce   :  { %v1392_v48 = vpop.f32.mrb[31].mxu1  ;;  %v1419_v54 = vmul.f32 %v1815_v14, %v2423_v37  ;;  %v1847_v37 = vpop.eup %1846 }
 0x1cf   :  { %v1417_v49 = vmul.f32 %v1392_v48, %v2429_v41  ;;  %1444 = vadd.xlane.f32.xlu1 %v1416_v31  ;;  %v2532_v41 = vpop.xlane.xlu1 %588  ;;  %v615_v43 = vmul.f32 %v1847_v37, %v2482_v61  ;;  %v1849_v1 = vpop.eup %1848 }
 0x1d0   :  { %v1851_v0 = vpop.eup %1850  ;;  %v622_v39 = vmul.f32 %v1849_v1, %v2494_v13  ;;  %v633_v1 = vand.u32 2147483648, %v2523_v32 }
 0x1d1   :  { %1446 = vadd.xlane.f32.xlu0 %v1417_v49  ;;  %v2530_v42 = vpop.xlane.xlu0 %1170  ;;  %v617_v53 = vsel %vm616_vm2, %v2482_v61, %v615_v43  ;;  %v1853_v60 = vpop.eup %1852  ;;  %v1207_v47 = vmul.f32 %v1851_v0, %v2490_v5  ;;  %vm646_vm2 = vcmp.eq.f32.partialorder %v2508_v27, 0.0 }
 0x1d2   :  { %v620_v61 = vsel %vm618_vm7, %v619_v6, %v617_v53  ;;  %v1855_v52 = vpop.eup %1854  ;;  %v601_v8 = vmul.f32 %v1853_v60, %v2487_v36  ;;  %v624_v4 = vsel %vm623_vm10, %v2494_v13, %v622_v39  ;;  %v1204_v13 = vand.u32 2147483648, %v2510_v9 }
 0x1d3   :  { %1448 = vadd.xlane.f32.xlu1 %v1418_v58  ;;  %v2539_v57 = vpop.xlane.xlu1 %1180  ;;  %v1209_v40 = vsel %vm1208_vm8, %v2490_v5, %v1207_v47  ;;  %v888_v17 = vmax.f32 %v620_v61, 1e-06  ;;  %v1857_v11 = vpop.eup %1856  ;;  %v1193_v12 = vmul.f32 %v1855_v52, %v2497_v16  ;;  %v627_v25 = vsel %vm625_vm14, %v626_v63, %v624_v4 }
 0x1d4   :  { %v1859_v33 = vpop.eup %1858  ;;  %v603_v18 = vsel %vm602_vm11, %v2487_v36, %v601_v8  ;;  %v2597_v23 = vsel %vm1210_vm9, %v1211_v45, %v1209_v40  ;;  %v608_v26 = vmul.f32 %v1857_v11, %v2504_v24  ;;  %v889_v44 = vmax.f32 %v627_v25, 1e-06 }
 0x1d5   :  { %1450 = vadd.xlane.f32.xlu0 %v1419_v54  ;;  %v2537_v21 = vpop.xlane.xlu0 %590  ;;  %v1861_v2 = vpop.eup %1860  ;;  %1874 = vrcp.f32 %v888_v17  ;;  %v2607_v19 = vsel %vm1194_vm13, %v2497_v16, %v1193_v12  ;;  %v1214_v56 = vmul.f32 %v1859_v33, %v2501_v20  ;;  %v606_v14 = vsel %vm604_vm12, %v605_v62, %v603_v18 }
 0x1d6   :  { %v1863_v3 = vpop.eup %1862  ;;  %1876 = vrsqrt.f32 %v2525_v38  ;;  %v643_v49 = vmul.f32 %v1861_v2, %v2508_v27  ;;  %v654_v58 = vand.u32 2147483648, %v2514_v34  ;;  %v610_v54 = vsel %vm609_vm15, %v2504_v24, %v608_v26 }
 0x1d7   :  { %v2549_v51 = vpop.xlane.xlu1 %584  ;;  %1878 = vrsqrt.f32 %v2532_v41  ;;  %v1865_v48 = vpop.eup %1864  ;;  %v1200_v37 = vmul.f32 %v1863_v3, %v2510_v9  ;;  %vm630_vm7 = vcmp.eq.f32.partialorder %v2523_v32, inf  ;;  %vm1243_vm8 = vcmp.eq.f32.partialorder %v2521_v22, inf }
 0x1d8   :  { %1880 = vrsqrt.f32 %v2530_v42  ;;  %v1867_v36 = vpop.eup %1866  ;;  %v2635_v6 = vsel %vm1215_vm0, %v2501_v20, %v1214_v56  ;;  %vm653_vm9 = vcmp.eq.f32.partialorder %v2514_v34, 0.0  ;;  %v1235_v53 = vmul.f32 %v1865_v48, %v2516_v28 }
 0x1d9   :  { %v2545_v46 = vpop.xlane.xlu0 %1182  ;;  %1882 = vrsqrt.f32 %v2539_v57  ;;  %v1869_v0 = vpop.eup %1868  ;;  %v886_v60 = vmax.f32 %v606_v14, 1e-06  ;;  %v645_v45 = vsel %vm644_vm3, %v2508_v27, %v643_v49  ;;  %vm1222_vm10 = vcmp.eq.f32.partialorder %v2527_v59, inf }
 0x1da   :  { %1884 = vrcp.f32 %v889_v44  ;;  %v1871_v47 = vpop.eup %1870  ;;  %v2653_v63 = vsel %vm1201_vm4, %v2510_v9, %v1200_v37  ;;  %v650_v8 = vmul.f32 %v1867_v36, %v2514_v34  ;;  %vm637_vm11 = vcmp.eq.f32.partialorder %v2525_v38, inf }
 0x1db   :  { %v2573_v35 = vpop.xlane.xlu1 %1176  ;;  %1886 = vrsqrt.f32 %v2537_v21  ;;  %v1873_v62 = vpop.eup %1872  ;;  %v629_v4 = vmul.f32 %v1869_v0, %v2523_v32  ;;  %v640_v40 = vand.u32 2147483648, %v2525_v38  ;;  %v613_v17 = vsel %vm611_vm1, %v612_v29, %v610_v54 }
 0x1dc   :  { %1888 = vrsqrt.f32 %v2549_v51  ;;  %v2670_v12 = vsel %vm1236_vm5, %v2516_v28, %v1235_v53  ;;  %v1242_v25 = vmul.f32 %v1871_v47, %v2521_v22  ;;  %vm672_vm12 = vcmp.eq.f32.partialorder %v2532_v41, inf }
 0x1dd   :  { %v2567_v30 = vpop.xlane.xlu0 %586  ;;  %1890 = vrsqrt.f32 %v2545_v46  ;;  %v1221_v18 = vmul.f32 %v1873_v62, %v2527_v59  ;;  %vm1229_vm13 = vcmp.eq.f32.partialorder %v2530_v42, inf  ;;  %v675_v24 = vand.u32 2147483648, %v2532_v41 }
 0x1de   :  { %1892 = vrsqrt.f32 %v2573_v35  ;;  %v652_v2 = vsel %vm651_vm6, %v2514_v34, %v650_v8  ;;  %v887_v44 = vmax.f32 %v613_v17, 1e-06  ;;  %v2688_v14 = vsel %vm630_vm7, %v2523_v32, %v629_v4 }
 0x1df   :  { %v2611_v5 = vpop.xlane.xlu1 %596  ;;  %v2665_v11 = vpop.eup %1874  ;;  %1894 = vrcp.f32 %v886_v60  ;;  %vm1264_vm14 = vcmp.eq.f32.partialorder %v2539_v57, inf  ;;  %v2698_v37 = vsel %vm1243_vm8, %v2521_v22, %v1242_v25  ;;  %vm632_vm15 = vcmp.eq.f32.partialorder %v2523_v32, 0.0 }
 0x1e0   :  { %v1877_v33 = vpop.eup %1876  ;;  %1896 = vrsqrt.f32 %v2567_v30  ;;  %vm679_vm0 = vcmp.eq.f32.partialorder %v2537_v21, inf  ;;  %v2709_v53 = vsel %vm1222_vm10, %v2527_v59, %v1221_v18  ;;  %v682_v47 = vand.u32 2147483648, %v2537_v21 }
 0x1e1   :  { %v2602_v55 = vpop.xlane.xlu0 %1178  ;;  %v1879_v29 = vpop.eup %1878  ;;  %1898 = vrsqrt.f32 %v2611_v5  ;;  %v636_v36 = vmul.f32 %v1877_v33, %v2525_v38  ;;  %v648_v62 = vsel %vm646_vm2, %v647_v7, %v645_v45  ;;  %vm639_vm1 = vcmp.eq.f32.partialorder %v2525_v38, 0.0 }
 0x1e2   :  { %v1881_v56 = vpop.eup %1880  ;;  %v671_v60 = vmul.f32 %v1879_v29, %v2532_v41  ;;  %vm658_vm3 = vcmp.eq.f32.partialorder %v2549_v51, inf  ;;  %v661_v17 = vand.u32 2147483648, %v2549_v51  ;;  %vm674_vm4 = vcmp.eq.f32.partialorder %v2532_v41, 0.0 }
 0x1e3   :  { %v2648_v52 = vpop.xlane.xlu1 %1188  ;;  %v1883_v54 = vpop.eup %1882  ;;  %v1228_v4 = vmul.f32 %v1881_v56, %v2530_v42  ;;  %vm1271_vm5 = vcmp.eq.f32.partialorder %v2545_v46, inf  ;;  %v655_v7 = vsel %vm653_vm9, %v654_v58, %v652_v2  ;;  %v638_v18 = vsel %vm637_vm11, %v2525_v38, %v636_v36 }
 0x1e4   :  { %v2704_v0 = vpop.eup %1884  ;;  %v1263_v33 = vmul.f32 %v1883_v54, %v2539_v57  ;;  %vm681_vm6 = vcmp.eq.f32.partialorder %v2537_v21, 0.0  ;;  %vm1250_vm2 = vcmp.eq.f32.partialorder %v2573_v35, inf  ;;  %v892_v56 = vmax.f32 %v648_v62, 1e-06 }
 0x1e5   :  { %v2640_v39 = vpop.xlane.xlu0 %598  ;;  %v1887_v8 = vpop.eup %1886  ;;  %v673_v34 = vsel %vm672_vm12, %v2532_v41, %v671_v60  ;;  %vm660_vm7 = vcmp.eq.f32.partialorder %v2549_v51, 0.0  ;;  %vm665_vm8 = vcmp.eq.f32.partialorder %v2567_v30, inf  ;;  %v2749_v36 = vsel %vm1229_vm13, %v2530_v42, %v1228_v4 }
 0x1e6   :  { %1900 = vrsqrt.f32 %v2640_v39  ;;  %v1889_v25 = vpop.eup %1888  ;;  %v678_v58 = vmul.f32 %v1887_v8, %v2537_v21  ;;  %vm667_vm9 = vcmp.eq.f32.partialorder %v2567_v30, 0.0  ;;  %v893_v60 = vmax.f32 %v655_v7, 1e-06 }
 0x1e7   :  { %v2693_v49 = vpop.xlane.xlu1 %592  ;;  %v1891_v45 = vpop.eup %1890  ;;  %v657_v62 = vmul.f32 %v1889_v25, %v2549_v51  ;;  %v2756_v8 = vsel %vm1264_vm14, %v2539_v57, %v1263_v33  ;;  %v668_v48 = vand.u32 2147483648, %v2567_v30  ;;  %vm700_vm10 = vcmp.eq.f32.partialorder %v2611_v5, inf }
 0x1e8   :  { %1902 = vrsqrt.f32 %v2693_v49  ;;  %v1893_v54 = vpop.eup %1892  ;;  %v1270_v27 = vmul.f32 %v1891_v45, %v2545_v46  ;;  %vm702_vm11 = vcmp.eq.f32.partialorder %v2611_v5, 0.0  ;;  %v680_v33 = vsel %vm679_vm0, %v2537_v21, %v678_v58 }
 0x1e9   :  { %v2683_v3 = vpop.xlane.xlu0 %1190  ;;  %1904 = vrcp.f32 %v887_v44  ;;  %v2744_v2 = vpop.eup %1894  ;;  %v1249_v4 = vmul.f32 %v1893_v54, %v2573_v35  ;;  %v703_v45 = vand.u32 2147483648, %v2611_v5  ;;  %v659_v54 = vsel %vm658_vm3, %v2549_v51, %v657_v62 }
 0x1ea   :  { %v1897_v29 = vpop.eup %1896  ;;  %vm1217_vm12 = vcmp.eq.f32.partialorder %v2501_v20, 0.0  ;;  %v2781_v58 = vsel %vm1271_vm5, %v2545_v46, %v1270_v27  ;;  %vm707_vm13 = vcmp.eq.f32.partialorder %v2640_v39, inf  ;;  %vm1196_vm14 = vcmp.eq.f32.partialorder %v2497_v16, 0.0 }
 0x1eb   :  { %v1899_v26 = vpop.eup %1898  ;;  %v664_v43 = vmul.f32 %v1897_v29, %v2567_v30  ;;  %v2775_v31 = vpop.xlane.xlu1 %1184  ;;  %v634_v29 = vsel %vm632_vm15, %v633_v1, %v2688_v14  ;;  %vm709_vm0 = vcmp.eq.f32.partialorder %v2640_v39, 0.0  ;;  %vm1257_vm15 = vcmp.eq.f32.partialorder %v2602_v55, inf }
 0x1ec   :  { %v699_v7 = vmul.f32 %v1899_v26, %v2611_v5  ;;  %v710_v26 = vand.u32 2147483648, %v2640_v39  ;;  %vm686_vm5 = vcmp.eq.f32.partialorder %v2693_v49, inf  ;;  %v641_v1 = vsel %vm639_vm1, %v640_v40, %v638_v18 }
 0x1ed   :  { %v2735_v44 = vpop.xlane.xlu0 %594  ;;  %v666_v14 = vsel %vm665_vm8, %v2567_v30, %v664_v43  ;;  %vm1238_vm3 = vcmp.eq.f32.partialorder %v2516_v28, 0.0  ;;  %v890_v40 = vmax.f32 %v634_v29, 1e-06  ;;  %v683_v43 = vsel %vm681_vm6, %v682_v47, %v680_v33 }
 0x1ee   :  { %1906 = vrsqrt.f32 %v2735_v44  ;;  %v701_v38 = vsel %vm700_vm10, %v2611_v5, %v699_v7  ;;  %vm1245_vm1 = vcmp.eq.f32.partialorder %v2521_v22, 0.0  ;;  %v662_v18 = vsel %vm660_vm7, %v661_v17, %v659_v54 }
 0x1ef   :  { %1908 = vrsqrt.f32 %v2602_v55  ;;  %v1302_v7 = vand.u32 2147483648, %v2683_v3  ;;  %v669_v33 = vsel %vm667_vm9, %v668_v48, %v666_v14  ;;  %vm1231_vm6 = vcmp.eq.f32.partialorder %v2530_v42, 0.0 }
 0x1f0   :  { %1910 = vrcp.f32 %v892_v56  ;;  %v1901_v25 = vpop.eup %1900  ;;  %v1281_v17 = vand.u32 2147483648, %v2775_v31  ;;  %v897_v54 = vmax.f32 %v683_v43, 1e-06  ;;  %vm693_vm7 = vcmp.eq.f32.partialorder %v2735_v44, inf }
 0x1f1   :  { %1912 = vrsqrt.f32 %v2648_v52  ;;  %v706_v27 = vmul.f32 %v1901_v25, %v2640_v39  ;;  %v2801_v56 = vpop.xlane.xlu0 %1186  ;;  %vm1278_vm8 = vcmp.eq.f32.partialorder %v2775_v31, inf  ;;  %v894_v30 = vmax.f32 %v662_v18, 1e-06 }
 0x1f2   :  { %v1903_v61 = vpop.eup %1902  ;;  %1914 = vrcp.f32 %v893_v60  ;;  %v2796_v60 = vsel %vm1250_vm2, %v2573_v35, %v1249_v4  ;;  %vm688_vm2 = vcmp.eq.f32.partialorder %v2693_v49, 0.0  ;;  %v689_v4 = vand.u32 2147483648, %v2693_v49 }
 0x1f3   :  { %v2790_v62 = vpop.eup %1904  ;;  %v685_v32 = vmul.f32 %v1903_v61, %v2693_v49  ;;  %1916 = vrsqrt.f32 %v2775_v31  ;;  %v676_v61 = vsel %vm674_vm4, %v675_v24, %v673_v34  ;;  %v708_v41 = vsel %vm707_vm13, %v2640_v39, %v706_v27 }
 0x1f4   :  { %1918 = vrsqrt.f32 %v2801_v56  ;;  %v891_v24 = vmax.f32 %v641_v1, 1e-06  ;;  %v896_v47 = vmax.f32 %v676_v61, 1e-06  ;;  %vm1224_vm4 = vcmp.eq.f32.partialorder %v2527_v59, 0.0 }
 0x1f5   :  { %1920 = vrsqrt.f32 %v2683_v3  ;;  %v687_v21 = vsel %vm686_vm5, %v2693_v49, %v685_v32  ;;  %v704_v27 = vsel %vm702_vm11, %v703_v45, %v701_v38  ;;  %v711_v48 = vsel %vm709_vm0, %v710_v26, %v708_v41 }
 0x1f6   :  { %1922 = vrcp.f32 %v890_v40  ;;  %vm1266_vm9 = vcmp.eq.f32.partialorder %v2539_v57, 0.0  ;;  %vm1273_vm10 = vcmp.eq.f32.partialorder %v2545_v46, 0.0  ;;  %v895_v5 = vmax.f32 %v669_v33, 1e-06 }
 0x1f7   :  { %1924 = vrcp.f32 %v891_v24  ;;  %v690_v45 = vsel %vm688_vm2, %v689_v4, %v687_v21  ;;  %vm695_vm11 = vcmp.eq.f32.partialorder %v2735_v44, 0.0  ;;  %v696_v61 = vand.u32 2147483648, %v2735_v44 }
 0x1f8   :  { %v1907_v25 = vpop.eup %1906  ;;  %1926 = vrcp.f32 %v896_v47  ;;  %v900_v39 = vmax.f32 %v704_v27, 1e-06  ;;  %vm1252_vm13 = vcmp.eq.f32.partialorder %v2573_v35, 0.0  ;;  %v1219_v49 = vsel %vm1217_vm12, %v1218_v15, %v2635_v6 }
 0x1f9   :  { %v1909_v34 = vpop.eup %1908  ;;  %v692_v51 = vmul.f32 %v1907_v25, %v2735_v44  ;;  %1928 = vrcp.f32 %v897_v54  ;;  %v901_v25 = vmax.f32 %v711_v48, 1e-06  ;;  %vm1259_vm0 = vcmp.eq.f32.partialorder %v2602_v55, 0.0 }
 0x1fa   :  { %v2845_v29 = vpop.eup %1910  ;;  %v1256_v14 = vmul.f32 %v1909_v34, %v2602_v55  ;;  %1930 = vrcp.f32 %v894_v30  ;;  %v898_v40 = vmax.f32 %v690_v45, 1e-06  ;;  %v1198_v43 = vsel %vm1196_vm14, %v1197_v10, %v2607_v19 }
 0x1fb   :  { %v1913_v1 = vpop.eup %1912  ;;  %v694_v26 = vsel %vm693_vm7, %v2735_v44, %v692_v51  ;;  %vm1280_vm12 = vcmp.eq.f32.partialorder %v2775_v31, 0.0  ;;  %1932 = vrcp.f32 %v895_v5  ;;  %v1454_v20 = vmax.f32 %v2597_v23, 1e-06 }
 0x1fc   :  { %v2857_v32 = vpop.eup %1914  ;;  %v2877_v38 = vmul.f32 %v1913_v1, %v2648_v52  ;;  %v1258_v41 = vsel %vm1257_vm15, %v2602_v55, %v1256_v14  ;;  %vm3327_vm5 = vcmp.eq.f32.partialorder %v2510_v9, 0.0  ;;  %vm1292_vm2 = vcmp.eq.f32.partialorder %v2648_v52, inf }
 0x1fd   :  { %v1917_v4 = vpop.eup %1916  ;;  %v1205_v15 = vsel %vm3327_vm5, %v1204_v13, %v2653_v63  ;;  %vm1299_vm14 = vcmp.eq.f32.partialorder %v2683_v3, inf  ;;  %vm1285_vm7 = vcmp.eq.f32.partialorder %v2801_v56, inf  ;;  %1934 = vrcp.f32 %v900_v39 }
 0x1fe   :  { %v1919_v6 = vpop.eup %1918  ;;  %v697_v16 = vsel %vm695_vm11, %v696_v61, %v694_v26  ;;  %v1455_v10 = vmax.f32 %v1219_v49, 1e-06  ;;  %v1277_v23 = vmul.f32 %v1917_v4, %v2775_v31  ;;  %1936 = vrcp.f32 %v901_v25 }
 0x1ff   :  { %v1921_v19 = vpop.eup %1920  ;;  %v1452_v24 = vmax.f32 %v1198_v43, 1e-06  ;;  %v3328_v9 = vand.u32 2147483648, %v2516_v28  ;;  %vm1287_vm15 = vcmp.eq.f32.partialorder %v2801_v56, 0.0  ;;  %1938 = vrcp.f32 %v898_v40 }
 0x200   :  { %v1453_v63 = vmax.f32 %v1205_v15, 1e-06  ;;  %v3329_v44 = vand.u32 2147483648, %v2521_v22  ;;  %vm1294_vm11 = vcmp.eq.f32.partialorder %v2648_v52, 0.0  ;;  %vm1301_vm5 = vcmp.eq.f32.partialorder %v2683_v3, 0.0 }
 0x201   :  { %v1240_v13 = vsel %vm1238_vm3, %v3328_v9, %v2670_v12  ;;  %v1284_v34 = vmul.f32 %v1919_v6, %v2801_v56  ;;  %v1288_v21 = vand.u32 2147483648, %v2801_v56  ;;  %v899_v28 = vmax.f32 %v697_v16, 1e-06  ;;  %v2915_v12 = vpop.eup %1922 }
 0x202   :  { %v1247_v18 = vsel %vm1245_vm1, %v3329_v44, %v2698_v37  ;;  %1940 = vrcp.f32 %v1454_v20  ;;  %v1458_v47 = vmax.f32 %v1240_v13, 1e-06  ;;  %v3330_v33 = vand.u32 2147483648, %v2527_v59  ;;  %v2927_v54 = vpop.eup %1924 }
 0x203   :  { %1942 = vrcp.f32 %v1455_v10  ;;  %v3331_v37 = vand.u32 2147483648, %v2530_v42  ;;  %v1298_v27 = vmul.f32 %v1921_v19, %v2683_v3  ;;  %v1279_v1 = vsel %vm1278_vm8, %v2775_v31, %v1277_v23  ;;  %v2933_v14 = vpop.eup %1926 }
 0x204   :  { %v1226_v22 = vsel %vm1224_vm4, %v3330_v33, %v2709_v53  ;;  %1944 = vrcp.f32 %v1452_v24  ;;  %v1459_v48 = vmax.f32 %v1247_v18, 1e-06  ;;  %v3332_v42 = vand.u32 2147483648, %v2539_v57  ;;  %v2946_v45 = vpop.eup %1928 }
 0x205   :  { %v1233_v51 = vsel %vm1231_vm6, %v3331_v37, %v2749_v36  ;;  %1946 = vrcp.f32 %v1453_v63  ;;  %v3333_v36 = vand.u32 2147483648, %v2545_v46  ;;  %v1286_v61 = vsel %vm1285_vm7, %v2801_v56, %v1284_v34  ;;  %v2951_v25 = vpop.eup %1930 }
 0x206   :  { %v1268_v53 = vsel %vm1266_vm9, %v3332_v42, %v2756_v8  ;;  %1948 = vrcp.f32 %v899_v28  ;;  %v1456_v39 = vmax.f32 %v1226_v22, 1e-06  ;;  %v1457_v26 = vmax.f32 %v1233_v51, 1e-06  ;;  %v2961_v49 = vpop.eup %1932 }
 0x207   :  { %v1275_v5 = vsel %vm1273_vm10, %v3333_v36, %v2781_v58  ;;  %1950 = vrcp.f32 %v1458_v47  ;;  %v3334_v46 = vand.u32 2147483648, %v2573_v35  ;;  %v1462_v40 = vmax.f32 %v1268_v53, 1e-06  ;;  %v2967_v6 = vpop.eup %1934 }
 0x208   :  { %1952 = vrcp.f32 %v1459_v48  ;;  %v1463_v43 = vmax.f32 %v1275_v5, 1e-06  ;;  %v3335_v20 = vand.u32 2147483648, %v2602_v55  ;;  %v2977_v10 = vpop.eup %1936  ;;  %v1293_v55 = vsel %vm1292_vm2, %v2648_v52, %v2877_v38 }
 0x209   :  { %v1254_v58 = vsel %vm1252_vm13, %v3334_v46, %v2796_v60  ;;  %v1282_v60 = vsel %vm1280_vm12, %v1281_v17, %v1279_v1  ;;  %1954 = vrcp.f32 %v1456_v39  ;;  %v1289_v44 = vsel %vm1287_vm15, %v1288_v21, %v1286_v61 }
 0x20a   :  { %v1261_v15 = vsel %vm1259_vm0, %v3335_v20, %v1258_v41  ;;  %v1300_v41 = vsel %vm1299_vm14, %v2683_v3, %v1298_v27  ;;  %v1460_v23 = vmax.f32 %v1254_v58, 1e-06  ;;  %1956 = vrcp.f32 %v1457_v26 }
 0x20b   :  { %v1461_v17 = vmax.f32 %v1261_v15, 1e-06  ;;  %1958 = vrcp.f32 %v1462_v40  ;;  %v1464_v63 = vmax.f32 %v1282_v60, 1e-06  ;;  %v3336_v28 = vand.u32 2147483648, %v2648_v52 }
 0x20c   :  { %1960 = vrcp.f32 %v1463_v43  ;;  %v1465_v52 = vmax.f32 %v1289_v44, 1e-06  ;;  %vm1031_vm3 = vcmp.eq.s32.totalorder %v2149_v50, 2  ;;  %vm998_vm1 = vcmp.eq.s32.totalorder %v2149_v50, 0 }
 0x20d   :  { %v1296_v47 = vsel %vm1294_vm11, %v3336_v28, %v1293_v55  ;;  %1962 = vrcp.f32 %v1460_v23  ;;  %vm1564_vm4 = vcmp.eq.s32.totalorder %v2149_v50, 1  ;;  %vm1597_vm6 = vcmp.eq.s32.totalorder %v2149_v50, 3 }
 0x20e   :  { %1964 = vrcp.f32 %v1461_v17 }
 0x20f   :  { %1966 = vrcp.f32 %v1464_v63 }
 0x210   :  { %1968 = vrcp.f32 %v1465_v52 }
 0x223   :  { %v859_v30 = vpop.xlane.xlu1 %858 }
 0x224   :  { %v907_v59 = vmul.f32 %v2665_v11, %v859_v30 }
 0x225   :  { %v861_v11 = vpop.xlane.xlu0 %860 }
 0x226   :  { %v2953_v57 = vmul.f32 0.5, %v907_v59  ;;  %v909_v8 = vmul.f32 %v2704_v0, %v861_v11 }
 0x227   :  { %v855_v4 = vpop.xlane.xlu1 %854 }
 0x228   :  { %v1676_v0 = vadd.f32 -0.5, %v2953_v57  ;;  %v2970_v16 = vmul.f32 0.5, %v909_v8  ;;  %v903_v35 = vmul.f32 %v2744_v2, %v855_v4  ;;  %v2986_v2 = vpop.eup %1938  ;;  %v1001_v23 = vsel %vm998_vm1, %v2953_v57, 0.0 }
 0x229   :  { %v857_v19 = vpop.xlane.xlu0 %856  ;;  %v2991_v9 = vpop.eup %1940 }
 0x22a   :  { %v1677_v24 = vadd.f32 -0.5, %v2970_v16  ;;  %v2989_v31 = vmul.f32 0.5, %v903_v35  ;;  %v905_v13 = vmul.f32 %v2790_v62, %v857_v19  ;;  %v2996_v18 = vpop.eup %1942  ;;  %v968_v34 = vadd.f32 1.0, %v1676_v0 }
 0x22b   :  { %v867_v38 = vpop.xlane.xlu1 %866  ;;  %v1303_v62 = vsel %vm1301_vm5, %v1302_v7, %v1300_v41  ;;  %v3006_v33 = vpop.eup %1944  ;;  %v1466_v7 = vmax.f32 %v1296_v47, 1e-06 }
 0x22c   :  { %v969_v22 = vadd.f32 1.0, %v1677_v24  ;;  %v1674_v56 = vadd.f32 -0.5, %v2989_v31  ;;  %v935_v21 = vmul.f32 0.5, %v905_v13  ;;  %v915_v37 = vmul.f32 %v2845_v29, %v867_v38  ;;  %v3010_v27 = vpop.eup %1946 }
 0x22d   :  { %v869_v51 = vpop.xlane.xlu0 %868  ;;  %v3013_v30 = vpop.eup %1948  ;;  %v1467_v59 = vmax.f32 %v1303_v62, 1e-06  ;;  %v984_v53 = vand.u32 2147483647, %v968_v34  ;;  %1970 = vrcp.f32 %v1466_v7  ;;  %v999_v13 = vsel %vm998_vm1, %v2989_v31, 0.0 }
 0x22e   :  { %v917_v1 = vmul.f32 %v2857_v32, %v869_v51  ;;  %v940_v48 = vmul.f32 0.5, %v915_v37  ;;  %v3015_v42 = vpop.eup %1950  ;;  %v1675_v36 = vadd.f32 -0.5, %v935_v21  ;;  %v985_v32 = vand.u32 2147483647, %v969_v22 }
 0x22f   :  { %v863_v3 = vpop.xlane.xlu1 %862  ;;  %v3018_v61 = vpop.eup %1952  ;;  %v966_v11 = vadd.f32 1.0, %v1674_v56  ;;  %v1034_v43 = vsel %vm1031_vm3, %v984_v53, 0.0  ;;  %1972 = vrcp.f32 %v1467_v59 }
 0x230   :  { %v941_v5 = vmul.f32 0.5, %v917_v1  ;;  %v911_v29 = vmul.f32 %v2915_v12, %v863_v3  ;;  %v1680_v26 = vadd.f32 -0.5, %v940_v48  ;;  %v3021_v46 = vpop.eup %1954  ;;  %v967_v20 = vadd.f32 1.0, %v1675_v36 }
 0x231   :  { %v865_v39 = vpop.xlane.xlu0 %864  ;;  %v3025_v12 = vpop.eup %1956  ;;  %v1035_v35 = vsel %vm1031_vm3, %v985_v32, 0.0  ;;  %v982_v60 = vand.u32 2147483647, %v966_v11  ;;  %v3050_v47 = vadd.f32 %v1034_v43, %v1001_v23 }
 0x232   :  { %v938_v8 = vmul.f32 0.5, %v911_v29  ;;  %v1681_v58 = vadd.f32 -0.5, %v941_v5  ;;  %v913_v4 = vmul.f32 %v2927_v54, %v865_v39  ;;  %v3030_v0 = vpop.eup %1958  ;;  %v972_v24 = vadd.f32 1.0, %v1680_v26 }
 0x233   :  { %v875_v40 = vpop.xlane.xlu1 %874  ;;  %v3034_v19 = vpop.eup %1960  ;;  %v983_v62 = vand.u32 2147483647, %v967_v20  ;;  %v1032_v31 = vsel %vm1031_vm3, %v982_v60, 0.0  ;;  %v1006_v36 = vsel %vm998_vm1, %v941_v5, 0.0 }
 0x234   :  { %v923_v15 = vmul.f32 %v2933_v14, %v875_v40  ;;  %v1678_v55 = vadd.f32 -0.5, %v938_v8  ;;  %v939_v41 = vmul.f32 0.5, %v913_v4  ;;  %v1002_v14 = vsel %vm998_vm1, %v2970_v16, 0.0  ;;  %v3048_v28 = vpop.eup %1962 }
 0x235   :  { %v877_v54 = vpop.xlane.xlu0 %876  ;;  %v973_v38 = vadd.f32 1.0, %v1681_v58  ;;  %v3052_v57 = vadd.f32 %v1035_v35, %v1002_v14  ;;  %v1000_v16 = vsel %vm998_vm1, %v935_v21, 0.0  ;;  %v3056_v22 = vpop.eup %1964  ;;  %v988_v1 = vand.u32 2147483647, %v972_v24 }
 0x236   :  { %v3042_v17 = vmul.f32 0.5, %v923_v15  ;;  %v1679_v63 = vadd.f32 -0.5, %v939_v41  ;;  %v925_v44 = vmul.f32 %v2946_v45, %v877_v54  ;;  %v970_v56 = vadd.f32 1.0, %v1678_v55  ;;  %v3063_v59 = vpop.eup %1966 }
 0x237   :  { %v871_v34 = vpop.xlane.xlu1 %870  ;;  %v1005_v21 = vsel %vm998_vm1, %v940_v48, 0.0  ;;  %v989_v53 = vand.u32 2147483647, %v973_v38  ;;  %v3069_v11 = vpop.eup %1968  ;;  %v1033_v39 = vsel %vm1031_vm3, %v983_v62, 0.0  ;;  %v3076_v4 = vadd.f32 %v1032_v31, %v999_v13 }
 0x238   :  { %v1684_v37 = vadd.f32 -0.5, %v3042_v17  ;;  %v945_v45 = vmul.f32 0.5, %v925_v44  ;;  %v971_v52 = vadd.f32 1.0, %v1679_v63  ;;  %v919_v3 = vmul.f32 %v2951_v25, %v871_v34  ;;  %v3074_v58 = vpop.eup %1970 }
 0x239   :  { %v873_v51 = vpop.xlane.xlu0 %872  ;;  %v986_v48 = vand.u32 2147483647, %v970_v56  ;;  %v1003_v40 = vsel %vm998_vm1, %v938_v8, 0.0  ;;  %v3080_v20 = vpop.eup %1972  ;;  %v1038_v15 = vsel %vm1031_vm3, %v988_v1, 0.0  ;;  %v3084_v54 = vadd.f32 %v1033_v39, %v1000_v16 }
 0x23a   :  { %v921_v7 = vmul.f32 %v2961_v49, %v873_v51  ;;  %v1685_v29 = vadd.f32 -0.5, %v945_v45  ;;  %v942_v26 = vmul.f32 0.5, %v919_v3  ;;  %v976_v5 = vadd.f32 1.0, %v1684_v37 }
 0x23b   :  { %v883_v32 = vpop.xlane.xlu1 %882  ;;  %v987_v35 = vand.u32 2147483647, %v971_v52  ;;  %v1004_v23 = vsel %vm998_vm1, %v939_v41, 0.0  ;;  %v3095_v44 = vadd.f32 %v1038_v15, %v1005_v21  ;;  %v1036_v34 = vsel %vm1031_vm3, %v986_v48, 0.0 }
 0x23c   :  { %v943_v25 = vmul.f32 0.5, %v921_v7  ;;  %v931_v49 = vmul.f32 %v2967_v6, %v883_v32  ;;  %v977_v60 = vadd.f32 1.0, %v1685_v29  ;;  %v1682_v55 = vadd.f32 -0.5, %v942_v26 }
 0x23d   :  { %v885_v43 = vpop.xlane.xlu0 %884  ;;  %v1039_v6 = vsel %vm1031_vm3, %v989_v53, 0.0  ;;  %v992_v62 = vand.u32 2147483647, %v976_v5  ;;  %v1037_v56 = vsel %vm1031_vm3, %v987_v35, 0.0  ;;  %v3107_v7 = vadd.f32 %v1036_v34, %v1003_v40 }
 0x23e   :  { %v1683_v14 = vadd.f32 -0.5, %v943_v25  ;;  %v974_v24 = vadd.f32 1.0, %v1682_v55  ;;  %v3091_v13 = vmul.f32 0.5, %v931_v49  ;;  %v933_v38 = vmul.f32 %v2977_v10, %v885_v43 }
 0x23f   :  { %v879_v8 = vpop.xlane.xlu1 %878  ;;  %v3099_v41 = vadd.f32 %v1039_v6, %v1006_v36  ;;  %v993_v37 = vand.u32 2147483647, %v977_v60  ;;  %v1009_v21 = vsel %vm998_vm1, %v3042_v17, 0.0  ;;  %v1042_v29 = vsel %vm1031_vm3, %v992_v62, 0.0 }
 0x240   :  { %v927_v63 = vmul.f32 %v2986_v2, %v879_v8  ;;  %v975_v16 = vadd.f32 1.0, %v1683_v14  ;;  %v1688_v51 = vadd.f32 -0.5, %v3091_v13  ;;  %v990_v1 = vand.u32 2147483647, %v974_v24 }
 0x241   :  { %v881_v31 = vpop.xlane.xlu0 %880  ;;  %v3104_v10 = vmul.f32 0.5, %v933_v38  ;;  %v1010_v32 = vsel %vm998_vm1, %v945_v45, 0.0  ;;  %v3119_v48 = vadd.f32 %v1037_v56, %v1004_v23  ;;  %v1043_v17 = vsel %vm1031_vm3, %v993_v37, 0.0 }
 0x242   :  { %v946_v2 = vmul.f32 0.5, %v927_v63  ;;  %v929_v52 = vmul.f32 %v3013_v30, %v881_v31  ;;  %v991_v53 = vand.u32 2147483647, %v975_v16  ;;  %v980_v39 = vadd.f32 1.0, %v1688_v51 }
 0x243   :  { %v1425_v3 = vpop.xlane.xlu1 %1424  ;;  %v1689_v49 = vadd.f32 -0.5, %v3104_v10  ;;  %v1040_v5 = vsel %vm1031_vm3, %v990_v1, 0.0  ;;  %v3130_v60 = vadd.f32 %v1042_v29, %v1009_v21  ;;  %v3135_v14 = vadd.f32 %v1043_v17, %v1010_v32 }
 0x244   :  { %v1473_v36 = vmul.f32 %v2991_v9, %v1425_v3  ;;  %v1007_v9 = vsel %vm998_vm1, %v942_v26, 0.0  ;;  %v1686_v40 = vadd.f32 -0.5, %v946_v2  ;;  %v3127_v43 = vmul.f32 0.5, %v929_v52 }
 0x245   :  { %v1427_v30 = vpop.xlane.xlu0 %1426  ;;  %v1041_v55 = vsel %vm1031_vm3, %v991_v53, 0.0  ;;  %v1008_v26 = vsel %vm998_vm1, %v943_v25, 0.0  ;;  %v996_v8 = vand.u32 2147483647, %v980_v39  ;;  %v3139_v24 = vadd.f32 1.0, %v1689_v49 }
 0x246   :  { %v1502_v45 = vmul.f32 0.5, %v1473_v36  ;;  %v1475_v15 = vmul.f32 %v2996_v18, %v1427_v30  ;;  %v978_v6 = vadd.f32 1.0, %v1686_v40  ;;  %v3141_v63 = vadd.f32 %v1040_v5, %v1007_v9 }
 0x247   :  { %v1421_v35 = vpop.xlane.xlu1 %1420  ;;  %v3145_v16 = vadd.f32 %v1041_v55, %v1008_v26  ;;  %v3151_v51 = vsel %vm998_vm1, %v946_v2, 0.0  ;;  %v3155_v3 = vsel %vm1031_vm3, %v996_v8, 0.0  ;;  %v997_v21 = vand.u32 2147483647, %v3139_v24 }
 0x248   :  { %v1469_v23 = vmul.f32 %v3006_v33, %v1421_v35  ;;  %v1700_v18 = vadd.f32 -0.5, %v1502_v45  ;;  %v1567_v34 = vsel %vm1564_vm4, %v1502_v45, 0.0  ;;  %v1503_v62 = vmul.f32 0.5, %v1475_v15 }
 0x249   :  { %v1423_v38 = vpop.xlane.xlu0 %1422  ;;  %v1687_v33 = vadd.f32 -0.5, %v3127_v43  ;;  %v1583_v31 = vadd.f32 %v1567_v34, %v3050_v47  ;;  %v994_v25 = vand.u32 2147483647, %v978_v6 }
 0x24a   :  { %v1500_v56 = vmul.f32 0.5, %v1469_v23  ;;  %v1534_v1 = vadd.f32 1.0, %v1700_v18  ;;  %v1701_v52 = vadd.f32 -0.5, %v1503_v62  ;;  %v1568_v53 = vsel %vm1564_vm4, %v1503_v62, 0.0 }
 0x24b   :  { %v1433_v37 = vpop.xlane.xlu1 %1432  ;;  %v1584_v39 = vadd.f32 %v1568_v53, %v3052_v57  ;;  %v3163_v49 = vadd.f32 1.0, %v1687_v33  ;;  %v1471_v9 = vmul.f32 %v3010_v27, %v1423_v38  ;;  %v3169_v5 = vsel %vm1031_vm3, %v994_v25, 0.0 }
 0x24c   :  { %v1698_v36 = vadd.f32 -0.5, %v1500_v56  ;;  %v1550_v29 = vand.u32 2147483647, %v1534_v1  ;;  %v1535_v32 = vadd.f32 1.0, %v1701_v52  ;;  %v1565_v2 = vsel %vm1564_vm4, %v1500_v56, 0.0 }
 0x24d   :  { %v1435_v47 = vpop.xlane.xlu0 %1434  ;;  %v1581_v17 = vadd.f32 %v1565_v2, %v3076_v4  ;;  %v1481_v57 = vmul.f32 %v3015_v42, %v1433_v37  ;;  %v1501_v6 = vmul.f32 0.5, %v1471_v9 }
 0x24e   :  { %v1532_v30 = vadd.f32 1.0, %v1698_v36  ;;  %v1600_v45 = vsel %vm1597_vm6, %v1550_v29, 0.0  ;;  %v1551_v15 = vand.u32 2147483647, %v1535_v32  ;;  %v1483_v23 = vmul.f32 %v3018_v61, %v1435_v47 }
 0x24f   :  { %v1429_v40 = vpop.xlane.xlu1 %1428  ;;  %v1616_v35 = vadd.f32 %v1600_v45, %v1583_v31  ;;  %v1506_v4 = vmul.f32 0.5, %v1481_v57  ;;  %v1699_v34 = vadd.f32 -0.5, %v1501_v6  ;;  %v1566_v61 = vsel %vm1564_vm4, %v1501_v6, 0.0 }
 0x250   :  { %v1548_v55 = vand.u32 2147483647, %v1532_v30  ;;  %v1601_v27 = vsel %vm1597_vm6, %v1551_v15, 0.0  ;;  %v1477_v8 = vmul.f32 %v3021_v46, %v1429_v40  ;;  %v1582_v31 = vadd.f32 %v1566_v61, %v3084_v54 }
 0x251   :  { %v1431_v26 = vpop.xlane.xlu0 %1430  ;;  %1632 = vst [vmem:[%s3326_s9 + $0x10] sm:$0xff] %v1616_v35  ;;  %v1617_v18 = vadd.f32 %v1601_v27, %v1584_v39  ;;  %v1704_v56 = vadd.f32 -0.5, %v1506_v4  ;;  %v1571_v46 = vsel %vm1564_vm4, %v1506_v4, 0.0  ;;  %v1507_v25 = vmul.f32 0.5, %v1483_v23 }
 0x252   :  { %v1479_v38 = vmul.f32 %v3025_v12, %v1431_v26  ;;  %v1598_v42 = vsel %vm1597_vm6, %v1548_v55, 0.0  ;;  %v1533_v12 = vadd.f32 1.0, %v1699_v34  ;;  %v1587_v37 = vadd.f32 %v1571_v46, %v3095_v44 }
 0x253   :  { %v1441_v62 = vpop.xlane.xlu1 %1440  ;;  %v1614_v33 = vadd.f32 %v1598_v42, %v1581_v17  ;;  %1633 = vst [vmem:[%s3326_s9 + $0x18] sm:$0xff] %v1617_v18  ;;  %v1504_v1 = vmul.f32 0.5, %v1477_v8  ;;  %v1538_v53 = vadd.f32 1.0, %v1704_v56  ;;  %v1705_v32 = vadd.f32 -0.5, %v1507_v25 }
 0x254   :  { %v1505_v54 = vmul.f32 0.5, %v1479_v38  ;;  %v1489_v36 = vmul.f32 %v3030_v0, %v1441_v62  ;;  %v1549_v29 = vand.u32 2147483647, %v1533_v12  ;;  %v1572_v39 = vsel %vm1564_vm4, %v1507_v25, 0.0 }
 0x255   :  { %v1443_v52 = vpop.xlane.xlu0 %1442  ;;  %1630 = vst [vmem:[%s3326_s9] sm:$0xff] %v1614_v33  ;;  %v1702_v2 = vadd.f32 -0.5, %v1504_v1  ;;  %v1554_v30 = vand.u32 2147483647, %v1538_v53  ;;  %v1588_v17 = vadd.f32 %v1572_v39, %v3099_v41  ;;  %v1569_v9 = vsel %vm1564_vm4, %v1504_v1, 0.0 }
 0x256   :  { %v1491_v47 = vmul.f32 %v3034_v19, %v1443_v52  ;;  %v1703_v40 = vadd.f32 -0.5, %v1505_v54  ;;  %v1599_v45 = vsel %vm1597_vm6, %v1549_v29, 0.0  ;;  %v1539_v0 = vadd.f32 1.0, %v1705_v32 }
 0x257   :  { %v1437_v44 = vpop.xlane.xlu1 %1436  ;;  %v1536_v15 = vadd.f32 1.0, %v1702_v2  ;;  %v1585_v19 = vadd.f32 %v1569_v9, %v3107_v7  ;;  %v1615_v35 = vadd.f32 %v1599_v45, %v1582_v31  ;;  %v1604_v55 = vsel %vm1597_vm6, %v1554_v30, 0.0 }
 0x258   :  { %v1537_v6 = vadd.f32 1.0, %v1703_v40  ;;  %v1570_v41 = vsel %vm1564_vm4, %v1505_v54, 0.0  ;;  %v1620_v23 = vadd.f32 %v1604_v55, %v1587_v37  ;;  %v1555_v26 = vand.u32 2147483647, %v1539_v0 }
 0x259   :  { %v1439_v57 = vpop.xlane.xlu0 %1438  ;;  %v1552_v27 = vand.u32 2147483647, %v1536_v15  ;;  %v1586_v4 = vadd.f32 %v1570_v41, %v3119_v48  ;;  %1631 = vst [vmem:[%s3326_s9 + $0x8] sm:$0xff] %v1615_v35  ;;  %v1510_v7 = vmul.f32 0.5, %v1489_v36  ;;  %v1511_v38 = vmul.f32 0.5, %v1491_v47 }
 0x25a   :  { %v1553_v8 = vand.u32 2147483647, %v1537_v6  ;;  %v1485_v18 = vmul.f32 %v3048_v28, %v1437_v44  ;;  %1636 = vst [vmem:[%s3326_s9 + $0x30] sm:$0xff] %v1620_v23  ;;  %v1605_v34 = vsel %vm1597_vm6, %v1555_v26, 0.0  ;;  %v1487_v61 = vmul.f32 %v3056_v22, %v1439_v57 }
 0x25b   :  { %v1602_v48 = vsel %vm1597_vm6, %v1552_v27, 0.0  ;;  %v1621_v33 = vadd.f32 %v1605_v34, %v1588_v17  ;;  %v1708_v56 = vadd.f32 -0.5, %v1510_v7  ;;  %v1575_v37 = vsel %vm1564_vm4, %v1510_v7, 0.0 }
 0x25c   :  { %v1445_v42 = vpop.xlane.xlu1 %1444  ;;  %v1618_v31 = vadd.f32 %v1602_v48, %v1585_v19  ;;  %v1603_v28 = vsel %vm1597_vm6, %v1553_v8, 0.0  ;;  %v1709_v25 = vadd.f32 -0.5, %v1511_v38  ;;  %v1576_v1 = vsel %vm1564_vm4, %v1511_v38, 0.0 }
 0x25d   :  { %v1493_v62 = vmul.f32 %v3063_v59, %v1445_v42  ;;  %v1619_v12 = vadd.f32 %v1603_v28, %v1586_v4  ;;  %1637 = vst [vmem:[%s3326_s9 + $0x38] sm:$0xff] %v1621_v33  ;;  %v1542_v22 = vadd.f32 1.0, %v1708_v56  ;;  %v1591_v59 = vadd.f32 %v1575_v37, %v3130_v60 }
 0x25e   :  { %v1447_v46 = vpop.xlane.xlu0 %1446  ;;  %1634 = vst [vmem:[%s3326_s9 + $0x20] sm:$0xff] %v1618_v31  ;;  %v1592_v52 = vadd.f32 %v1576_v1, %v3135_v14  ;;  %v1508_v53 = vmul.f32 0.5, %v1485_v18  ;;  %v1060_v36 = vadd.f32 %v3169_v5, %v3151_v51  ;;  %v1543_v47 = vadd.f32 1.0, %v1709_v25 }
 0x25f   :  { %1635 = vst [vmem:[%s3326_s9 + $0x28] sm:$0xff] %v1619_v12  ;;  %v1509_v29 = vmul.f32 0.5, %v1487_v61  ;;  %v1512_v32 = vmul.f32 0.5, %v1493_v62  ;;  %v995_v39 = vand.u32 2147483647, %v3163_v49  ;;  %v1495_v17 = vmul.f32 %v3069_v11, %v1447_v46 }
 0x260   :  { %v1449_v54 = vpop.xlane.xlu1 %1448  ;;  %v1558_v2 = vand.u32 2147483647, %v1542_v22  ;;  %v1706_v44 = vadd.f32 -0.5, %v1508_v53  ;;  %v1573_v60 = vsel %vm1564_vm4, %v1508_v53, 0.0  ;;  %v1559_v14 = vand.u32 2147483647, %v1543_v47 }
 0x261   :  { %v1707_v30 = vadd.f32 -0.5, %v1509_v29  ;;  %v1497_v51 = vmul.f32 %v3074_v58, %v1449_v54  ;;  %v1589_v40 = vadd.f32 %v1573_v60, %v3141_v63  ;;  %v1710_v45 = vadd.f32 -0.5, %v1512_v32 }
 0x262   :  { %v1608_v5 = vsel %vm1597_vm6, %v1558_v2, 0.0  ;;  %v1540_v9 = vadd.f32 1.0, %v1706_v44  ;;  %v1451_v0 = vpop.xlane.xlu0 %1450  ;;  %v1609_v15 = vsel %vm1597_vm6, %v1559_v14, 0.0  ;;  %v1574_v57 = vsel %vm1564_vm4, %v1509_v29, 0.0 }
 0x263   :  { %v1624_v49 = vadd.f32 %v1608_v5, %v1591_v59  ;;  %v1541_v19 = vadd.f32 1.0, %v1707_v30  ;;  %v1625_v35 = vadd.f32 %v1609_v15, %v1592_v52  ;;  %v1544_v55 = vadd.f32 1.0, %v1710_v45 }
 0x264   :  { %v1556_v11 = vand.u32 2147483647, %v1540_v9  ;;  %v1577_v58 = vsel %vm1564_vm4, %v1512_v32, 0.0  ;;  %v1513_v6 = vmul.f32 0.5, %v1495_v17  ;;  %v1514_v41 = vmul.f32 0.5, %v1497_v51 }
 0x265   :  { %1640 = vst [vmem:[%s3326_s9 + $0x50] sm:$0xff] %v1624_v49  ;;  %v1557_v63 = vand.u32 2147483647, %v1541_v19  ;;  %v1499_v23 = vmul.f32 %v3080_v20, %v1451_v0  ;;  %v1045_v26 = vsel %vm1031_vm3, %v995_v39, 0.0  ;;  %1641 = vst [vmem:[%s3326_s9 + $0x58] sm:$0xff] %v1625_v35  ;;  %v1590_v4 = vadd.f32 %v1574_v57, %v3145_v16 }
 0x266   :  { %v1606_v27 = vsel %vm1597_vm6, %v1556_v11, 0.0  ;;  %v1560_v8 = vand.u32 2147483647, %v1544_v55  ;;  %v1593_v18 = vadd.f32 %v1577_v58, %v1060_v36  ;;  %v1711_v42 = vadd.f32 -0.5, %v1513_v6 }
 0x267   :  { %v1622_v7 = vadd.f32 %v1606_v27, %v1589_v40  ;;  %v1607_v38 = vsel %vm1597_vm6, %v1557_v63, 0.0  ;;  %v1012_v20 = vsel %vm998_vm1, %v3127_v43, 0.0  ;;  %v1712_v61 = vadd.f32 -0.5, %v1514_v41 }
 0x268   :  { %v1623_v34 = vadd.f32 %v1607_v38, %v1590_v4  ;;  %v1610_v48 = vsel %vm1597_vm6, %v1560_v8, 0.0  ;;  %v1545_v62 = vadd.f32 1.0, %v1711_v42  ;;  %v1578_v33 = vsel %vm1564_vm4, %v1513_v6, 0.0 }
 0x269   :  { %1638 = vst [vmem:[%s3326_s9 + $0x40] sm:$0xff] %v1622_v7  ;;  %v1626_v16 = vadd.f32 %v1610_v48, %v1593_v18  ;;  %v1515_v31 = vmul.f32 0.5, %v1499_v23  ;;  %v1013_v28 = vsel %vm998_vm1, %v3091_v13, 0.0  ;;  %v1061_v43 = vadd.f32 %v1045_v26, %v1012_v20 }
 0x26a   :  { %1639 = vst [vmem:[%s3326_s9 + $0x48] sm:$0xff] %v1623_v34  ;;  %v1546_v56 = vadd.f32 1.0, %v1712_v61  ;;  %v1579_v46 = vsel %vm1564_vm4, %v1514_v41, 0.0  ;;  %v1062_v12 = vadd.f32 %v3155_v3, %v1013_v28  ;;  %v1047_v37 = vsel %vm1031_vm3, %v997_v21, 0.0 }
 0x26b   :  { %1642 = vst [vmem:[%s3326_s9 + $0x60] sm:$0xff] %v1626_v16  ;;  %v1561_v13 = vand.u32 2147483647, %v1545_v62  ;;  %v1713_v25 = vadd.f32 -0.5, %v1515_v31  ;;  %v1014_v1 = vsel %vm998_vm1, %v3104_v10, 0.0  ;;  %v1594_v22 = vadd.f32 %v1578_v33, %v1061_v43 }
 0x26c   :  { %v1562_v59 = vand.u32 2147483647, %v1546_v56  ;;  %v1595_v52 = vadd.f32 %v1579_v46, %v1062_v12  ;;  %v1580_v21 = vsel %vm1564_vm4, %v1515_v31, 0.0  ;;  %v1063_v53 = vadd.f32 %v1047_v37, %v1014_v1 }
 0x26d   :  { %v1611_v3 = vsel %vm1597_vm6, %v1561_v13, 0.0  ;;  %v1547_v24 = vadd.f32 1.0, %v1713_v25 }
 0x26e   :  { %v1627_v54 = vadd.f32 %v1611_v3, %v1594_v22  ;;  %v1612_v36 = vsel %vm1597_vm6, %v1562_v59, 0.0  ;;  %v1596_v10 = vadd.f32 %v1580_v21, %v1063_v53 }
 0x26f   :  { %v1628_v47 = vadd.f32 %v1612_v36, %v1595_v52  ;;  %v1563_v29 = vand.u32 2147483647, %v1547_v24 }
 0x270   :  { %1643 = vst [vmem:[%s3326_s9 + $0x68] sm:$0xff] %v1627_v54 }
 0x271   :  { %1644 = vst [vmem:[%s3326_s9 + $0x70] sm:$0xff] %v1628_v47  ;;  %v1613_v32 = vsel %vm1597_vm6, %v1563_v29, 0.0 }
 0x272   :  { %v1629_v39 = vadd.f32 %v1613_v32, %v1596_v10 }
 0x274   :  { %1645 = vst [vmem:[%s3326_s9 + $0x78] sm:$0xff] %v1629_v39 }

</bundles_post_ra>
